<compile_context>
chip_gen: v5e
topology: v5e:2x2
jax: 0.10.0
libtpu: 0.0.40
codegen_flags: <defaults>
</compile_context>

<pallas_src>
import math

import jax
import jax.numpy as jnp
from jax import lax
from jax.experimental import pallas as pl
from jax.experimental.pallas import tpu as pltpu


_HSEQ_STORE_GROUP = 4  # 4 * N(=32) = 128 lanes -> unmasked, lane-dense stores


def _transpose_via_mxu(eye, m):
    """m^T computed as eye @ m^T (the standard A @ B^T MXU form, like q @ k.T)."""
    return lax.dot_general(eye, m, (((1,), (1,)), ((), ())),
                           preferred_element_type=jnp.float32)


def lstm_kernel(xs_ref, ut_ref, vt_ref, b_ref, eye_ref,
                hseq_ref, h_ref, c_ref, xproj_ref):
    """Whole LSTM forward in one invocation (transposed / lane-dense layout).

    xs_ref   : (T*N, N)   all x_t^T stacked along rows (row block t == x_t^T)
    ut_ref   : (N, 4N)    [U_i^T | U_f^T | U_o^T | U_c^T], i/f/o cols pre-scaled by 0.5
    vt_ref   : (N, 4N)    [V_i^T | V_f^T | V_o^T | V_c^T], i/f/o cols pre-scaled by 0.5
    b_ref    : (1, 4N)    fused bias (b_u + b_v) row, i/f/o entries pre-scaled by 0.5
    eye_ref  : (N, N)     identity, used for MXU-based 32x32 transposes
    hseq_ref : (N, T*N)   hidden sequence, ALREADY in module layout (== (N,T,N) row-major)
    h_ref    : (N, N)     final h (module layout, un-transposed)
    c_ref    : (N, N)     final c (module layout, un-transposed)
    xproj_ref: (T*N, 4N)  VMEM scratch holding the hoisted input projection
    """
    N = ut_ref.shape[0]
    T = xs_ref.shape[0] // N

    # Hoisted input projection + fused bias: one big MXU matmul, off the
    # serial dependence chain.
    xproj_ref[...] = (
        jnp.dot(xs_ref[...], ut_ref[...], preferred_element_type=jnp.float32)
        + b_ref[...])

    vt = vt_ref[...]      # (N, 4N), constant over the recurrence; hoisted once
    eye = eye_ref[...]    # (N, N)

    h = None              # h_t^T, carried in vregs
    c = None              # c_t^T, carried in vregs
    group = []            # pending h_t^T blocks for one lane-dense hseq store
    group_start = 0

    for t in range(T):    # static unroll; T is small
        z = xproj_ref[t * N:(t + 1) * N, :]                       # (N, 4N)
        if t > 0:
            # Only op on the serial chain: one fused (N,N) @ (N,4N) matmul.
            z = z + jnp.dot(h, vt, preferred_element_type=jnp.float32)

        # One full-(N, 4N) tanh pass.  sigmoid(x) == 0.5*(1 + tanh(x/2)); the
        # /2 was folded into the i/f/o columns of ut/vt/b in the wrapper.
        th = jnp.tanh(z)
        i_t = 0.5 + 0.5 * th[:, 0:N]
        o_t = 0.5 + 0.5 * th[:, 2 * N:3 * N]
        g_t = th[:, 3 * N:]
        if t == 0:
            c = i_t * g_t                      # peeled step: h0 = c0 = 0
        else:
            f_t = 0.5 + 0.5 * th[:, N:2 * N]
            c = f_t * c + i_t * g_t
        h = o_t * jnp.tanh(c)

        group.append(h)
        if len(group) == _HSEQ_STORE_GROUP or t == T - 1:
            hcat = group[0] if len(group) == 1 else jnp.concatenate(group, axis=0)
            # (len*N, N) --MXU transpose--> (N, len*N) lane-dense slab, one
            # unmasked 128-lane-wide store per group (off the critical path).
            hseq_ref[:, group_start * N:(t + 1) * N] = _transpose_via_mxu(eye, hcat)
            group_start = t + 1
            group = []

    # Final states, already in the module's (un-transposed) layout.
    h_ref[...] = _transpose_via_mxu(eye, h)
    c_ref[...] = _transpose_via_mxu(eye, c)


def _prepare_params(U, V, b_u, b_v):
    """Fused / transposed / gate-prescaled weights for the kernel.

    The i, f, o gate columns of U^T, V^T and the fused bias are pre-scaled by
    0.5 so the kernel can compute sigmoid via a single full-width tanh.
    Call once (outside the hot path) if weights are reused across calls.
    """
    Nh = U.shape[2]
    ut = jnp.transpose(U.astype(jnp.float32), (2, 0, 1)).reshape(Nh, 4 * Nh)
    vt = jnp.transpose(V.astype(jnp.float32), (2, 0, 1)).reshape(Nh, 4 * Nh)
    b = (b_u + b_v).astype(jnp.float32).reshape(1, 4 * Nh)
    scale = jnp.concatenate(
        [jnp.full((3 * Nh,), 0.5, jnp.float32),
         jnp.ones((Nh,), jnp.float32)])[None, :]
    eye = jnp.eye(Nh, dtype=jnp.float32)
    return ut * scale, vt * scale, b * scale, eye


@jax.jit
def lstm_forward_prepared(x, ut, vt, b, eye):
    """Kernel call with already-prepared (fused/prescaled) weights."""
    N, T, _ = x.shape
    x = x.astype(jnp.float32)
    # x_t^T stacked along rows: xs[t*N + j, a] = x[a, t, j]
    xs = jnp.transpose(x, (1, 2, 0)).reshape(T * N, N)

    cost = pl.CostEstimate(
        flops=(2 * T * N * N * 4 * N            # hoisted input projection
               + 2 * (T - 1) * N * N * 4 * N    # recurrent matmuls
               + 2 * (T + 2) * N * N * N),      # MXU-based output transposes
        transcendentals=5 * T * N * N,
        bytes_accessed=4 * (T * N * N + 2 * N * 4 * N + 4 * N + N * N
                            + T * N * N + 2 * N * N))

    hseq2d, h_t, c_t = pl.pallas_call(
        lstm_kernel,
        out_shape=(
            jax.ShapeDtypeStruct((N, T * N), jnp.float32),   # hidden_seq (row-major (N,T,N))
            jax.ShapeDtypeStruct((N, N), jnp.float32),       # final h
            jax.ShapeDtypeStruct((N, N), jnp.float32),       # final c
        ),
        grid=(1,),
        in_specs=[
            pl.BlockSpec((T * N, N), lambda i: (0, 0)),      # xs
            pl.BlockSpec((N, 4 * N), lambda i: (0, 0)),      # fused U^T (prescaled)
            pl.BlockSpec((N, 4 * N), lambda i: (0, 0)),      # fused V^T (prescaled)
            pl.BlockSpec((1, 4 * N), lambda i: (0, 0)),      # fused bias row (prescaled)
            pl.BlockSpec((N, N), lambda i: (0, 0)),          # identity
        ],
        out_specs=(
            pl.BlockSpec((N, T * N), lambda i: (0, 0)),
            pl.BlockSpec((N, N), lambda i: (0, 0)),
            pl.BlockSpec((N, N), lambda i: (0, 0)),
        ),
        scratch_shapes=[pltpu.VMEM((T * N, 4 * N), jnp.float32)],
        compiler_params=pltpu.CompilerParams(
            dimension_semantics=("arbitrary",)),
        cost_estimate=cost,
    )(xs, ut, vt, b, eye)

    # (N, T*N) -> (N, T, N) is a contiguous reshape: no data movement under jit.
    return hseq2d.reshape(N, T, N), (h_t, c_t)


@jax.jit
def my_lstm_forward(x, U, V, b_u, b_v):
    """Full forward matching MyLSTM.forward(x) with zero initial states."""
    ut, vt, b, eye = _prepare_params(U, V, b_u, b_v)
    return lstm_forward_prepared(x, ut, vt, b, eye)


def reference_forward(x, U, V, b_u, b_v):
    """Plain-JAX replica of the PyTorch forward (for correctness checking)."""
    N, T, _ = x.shape
    h = jnp.zeros((N, N), jnp.float32)
    c = jnp.zeros((N, N), jnp.float32)
    seq = []
    for t in range(T):
        x_t = x[:, t, :]
        i_t = jax.nn.sigmoid(U[0] @ x_t + b_u[0] + V[0] @ h + b_v[0])
        f_t = jax.nn.sigmoid(U[1] @ x_t + b_u[1] + V[1] @ h + b_v[1])
        o_t = jax.nn.sigmoid(U[2] @ x_t + b_u[2] + V[2] @ h + b_v[2])
        g_t = jnp.tanh(U[3] @ x_t + b_u[3] + V[3] @ h + b_v[3])
        c = f_t * c + i_t * g_t
        h = o_t * jnp.tanh(c)
        seq.append(h[None])
    hseq = jnp.concatenate(seq, axis=0)
    return jnp.transpose(hseq, (1, 0, 2)), (h, c)


def init_params(key, input_size, hidden_size):
    """Deterministic replica of init_weights(): uniform(-stdv, stdv)."""
    stdv = 1.0 / math.sqrt(hidden_size)
    ks = jax.random.split(key, 16)

    def u(k, shape):
        return jax.random.uniform(k, shape, jnp.float32, -stdv, stdv)

    # gate order: i, f, o, c
    U = jnp.stack([u(ks[0], (input_size, hidden_size)),
                   u(ks[1], (input_size, hidden_size)),
                   u(ks[2], (input_size, hidden_size)),
                   u(ks[3], (input_size, hidden_size))])
    V = jnp.stack([u(ks[4], (hidden_size, hidden_size)),
                   u(ks[5], (hidden_size, hidden_size)),
                   u(ks[6], (hidden_size, hidden_size)),
                   u(ks[7], (hidden_size, hidden_size))])
    bu = jnp.stack([u(ks[8], (hidden_size, 1)), u(ks[9], (hidden_size, 1)),
                    u(ks[10], (hidden_size, 1)), u(ks[11], (hidden_size, 1))])
    bv = jnp.stack([u(ks[12], (hidden_size, 1)), u(ks[13], (hidden_size, 1)),
                    u(ks[14], (hidden_size, 1)), u(ks[15], (hidden_size, 1))])
    return U, V, bu, bv


if __name__ == "__main__":
    N = 32    # batch == hidden == input (required by the module's matmul shapes)
    T = 8     # sequence length

    key = jax.random.PRNGKey(0)
    kx, kp = jax.random.split(key)
    x = jax.random.normal(kx, (N, T, N), jnp.float32)
    U, V, b_u, b_v = init_params(kp, input_size=N, hidden_size=N)

    hidden_seq, (h_T, c_T) = my_lstm_forward(x, U, V, b_u, b_v)
    jax.block_until_ready((hidden_seq, h_T, c_T))

    # Correctness check against a plain-JAX reference of the PyTorch forward.
    ref_seq, (ref_h, ref_c) = reference_forward(x, U, V, b_u, b_v)
    assert hidden_seq.shape == (N, T, N)
    assert jnp.allclose(hidden_seq, ref_seq, atol=1e-5, rtol=1e-5)
    assert jnp.allclose(h_T, ref_h, atol=1e-5, rtol=1e-5)
    assert jnp.allclose(c_T, ref_c, atol=1e-5, rtol=1e-5)

    print("KERNEL_OK")
</pallas_src>

<mosaic_0001>
module attributes {stable_mosaic.version = 11 : i64} {
  func.func @lstm_kernel(%arg0: i32, %arg1: memref<256x32xf32, #tpu.memory_space<vmem>>, %arg2: memref<32x128xf32, #tpu.memory_space<vmem>>, %arg3: memref<32x128xf32, #tpu.memory_space<vmem>>, %arg4: memref<1x128xf32, #tpu.memory_space<vmem>>, %arg5: memref<32x32xf32, #tpu.memory_space<vmem>>, %arg6: memref<32x256xf32, #tpu.memory_space<vmem>>, %arg7: memref<32x32xf32, #tpu.memory_space<vmem>>, %arg8: memref<32x32xf32, #tpu.memory_space<vmem>>, %arg9: memref<256x128xf32, #tpu.memory_space<vmem>>) attributes {dimension_semantics = [#tpu.dimension_semantics<arbitrary>], iteration_bounds = array<i64: 1>, scalar_prefetch = 0 : i64, scratch_operands = 1 : i64, tpu.core_type = #tpu.core_type<tc>, window_params = [{pipeline_mode = #tpu.pipeline_mode<synchronous>, transform_indices = @transform_0, window_bounds = array<i64: 256, 32>}, {pipeline_mode = #tpu.pipeline_mode<synchronous>, transform_indices = @transform_1, window_bounds = array<i64: 32, 128>}, {pipeline_mode = #tpu.pipeline_mode<synchronous>, transform_indices = @transform_2, window_bounds = array<i64: 32, 128>}, {pipeline_mode = #tpu.pipeline_mode<synchronous>, transform_indices = @transform_3, window_bounds = array<i64: 1, 128>}, {pipeline_mode = #tpu.pipeline_mode<synchronous>, transform_indices = @transform_4, window_bounds = array<i64: 32, 32>}, {pipeline_mode = #tpu.pipeline_mode<synchronous>, transform_indices = @transform_5, window_bounds = array<i64: 32, 256>}, {pipeline_mode = #tpu.pipeline_mode<synchronous>, transform_indices = @transform_6, window_bounds = array<i64: 32, 32>}, {pipeline_mode = #tpu.pipeline_mode<synchronous>, transform_indices = @transform_7, window_bounds = array<i64: 32, 32>}]} {
    %c0 = arith.constant 0 : index
    %c0_0 = arith.constant 0 : index
    %0 = vector.load %arg1[%c0, %c0_0] : memref<256x32xf32, #tpu.memory_space<vmem>>, vector<256x32xf32>
    %c0_1 = arith.constant 0 : index
    %c0_2 = arith.constant 0 : index
    %1 = vector.load %arg2[%c0_1, %c0_2] : memref<32x128xf32, #tpu.memory_space<vmem>>, vector<32x128xf32>
    %cst = arith.constant dense<0.000000e+00> : vector<256x128xf32>
    %2 = tpu.matmul %0, %1, %cst {dimension_numbers = #tpu.dot_dimension_numbers<[1], [0], [0], [1], [0, 0, 1, 1], [], []>} : vector<256x32xf32>, vector<32x128xf32>, vector<256x128xf32> -> vector<256x128xf32>
    %c0_3 = arith.constant 0 : index
    %c0_4 = arith.constant 0 : index
    %3 = vector.load %arg4[%c0_3, %c0_4] : memref<1x128xf32, #tpu.memory_space<vmem>>, vector<1x128xf32>
    %4 = vector.broadcast %3 : vector<1x128xf32> to vector<256x128xf32>
    %5 = arith.addf %2, %4 : vector<256x128xf32>
    %c0_5 = arith.constant 0 : index
    %c0_6 = arith.constant 0 : index
    %6 = vector.load %arg9[%c0_5, %c0_6] : memref<256x128xf32, #tpu.memory_space<vmem>>, vector<256x128xf32>
    tpu.vector_store %arg9[%c0_5, %c0_6], %5 {strides = array<i32>} : memref<256x128xf32, #tpu.memory_space<vmem>>, vector<256x128xf32>,
    %c0_7 = arith.constant 0 : index
    %c0_8 = arith.constant 0 : index
    %7 = vector.load %arg3[%c0_7, %c0_8] : memref<32x128xf32, #tpu.memory_space<vmem>>, vector<32x128xf32>
    %c0_9 = arith.constant 0 : index
    %c0_10 = arith.constant 0 : index
    %8 = vector.load %arg5[%c0_9, %c0_10] : memref<32x32xf32, #tpu.memory_space<vmem>>, vector<32x32xf32>
    %c0_11 = arith.constant 0 : index
    %c0_12 = arith.constant 0 : index
    %9 = vector.load %arg9[%c0_11, %c0_12] : memref<256x128xf32, #tpu.memory_space<vmem>>, vector<32x128xf32>
    %10 = math.tanh %9 : vector<32x128xf32>
    %11 = vector.extract_strided_slice %10 {offsets = [0, 0], sizes = [32, 32], strides = [1, 1]} : vector<32x128xf32> to vector<32x32xf32>
    %cst_13 = arith.constant 5.000000e-01 : f32
    %12 = vector.broadcast %cst_13 : f32 to vector<32x32xf32>
    %13 = arith.mulf %12, %11 : vector<32x32xf32>
    %cst_14 = arith.constant 5.000000e-01 : f32
    %14 = vector.broadcast %cst_14 : f32 to vector<32x32xf32>
    %15 = arith.addf %14, %13 : vector<32x32xf32>
    %16 = vector.extract_strided_slice %10 {offsets = [0, 64], sizes = [32, 32], strides = [1, 1]} : vector<32x128xf32> to vector<32x32xf32>
    %cst_15 = arith.constant 5.000000e-01 : f32
    %17 = vector.broadcast %cst_15 : f32 to vector<32x32xf32>
    %18 = arith.mulf %17, %16 : vector<32x32xf32>
    %cst_16 = arith.constant 5.000000e-01 : f32
    %19 = vector.broadcast %cst_16 : f32 to vector<32x32xf32>
    %20 = arith.addf %19, %18 : vector<32x32xf32>
    %21 = vector.extract_strided_slice %10 {offsets = [0, 96], sizes = [32, 32], strides = [1, 1]} : vector<32x128xf32> to vector<32x32xf32>
    %22 = arith.mulf %15, %21 : vector<32x32xf32>
    %23 = math.tanh %22 : vector<32x32xf32>
    %24 = arith.mulf %20, %23 : vector<32x32xf32>
    %c32 = arith.constant 32 : index
    %c0_17 = arith.constant 0 : index
    %25 = vector.load %arg9[%c32, %c0_17] : memref<256x128xf32, #tpu.memory_space<vmem>>, vector<32x128xf32>
    %cst_18 = arith.constant dense<0.000000e+00> : vector<32x128xf32>
    %26 = tpu.matmul %24, %7, %cst_18 {dimension_numbers = #tpu.dot_dimension_numbers<[1], [0], [0], [1], [0, 0, 1, 1], [], []>} : vector<32x32xf32>, vector<32x128xf32>, vector<32x128xf32> -> vector<32x128xf32>
    %27 = arith.addf %25, %26 : vector<32x128xf32>
    %28 = math.tanh %27 : vector<32x128xf32>
    %29 = vector.extract_strided_slice %28 {offsets = [0, 0], sizes = [32, 32], strides = [1, 1]} : vector<32x128xf32> to vector<32x32xf32>
    %cst_19 = arith.constant 5.000000e-01 : f32
    %30 = vector.broadcast %cst_19 : f32 to vector<32x32xf32>
    %31 = arith.mulf %30, %29 : vector<32x32xf32>
    %cst_20 = arith.constant 5.000000e-01 : f32
    %32 = vector.broadcast %cst_20 : f32 to vector<32x32xf32>
    %33 = arith.addf %32, %31 : vector<32x32xf32>
    %34 = vector.extract_strided_slice %28 {offsets = [0, 64], sizes = [32, 32], strides = [1, 1]} : vector<32x128xf32> to vector<32x32xf32>
    %cst_21 = arith.constant 5.000000e-01 : f32
    %35 = vector.broadcast %cst_21 : f32 to vector<32x32xf32>
    %36 = arith.mulf %35, %34 : vector<32x32xf32>
    %cst_22 = arith.constant 5.000000e-01 : f32
    %37 = vector.broadcast %cst_22 : f32 to vector<32x32xf32>
    %38 = arith.addf %37, %36 : vector<32x32xf32>
    %39 = vector.extract_strided_slice %28 {offsets = [0, 96], sizes = [32, 32], strides = [1, 1]} : vector<32x128xf32> to vector<32x32xf32>
    %40 = vector.extract_strided_slice %28 {offsets = [0, 32], sizes = [32, 32], strides = [1, 1]} : vector<32x128xf32> to vector<32x32xf32>
    %cst_23 = arith.constant 5.000000e-01 : f32
    %41 = vector.broadcast %cst_23 : f32 to vector<32x32xf32>
    %42 = arith.mulf %41, %40 : vector<32x32xf32>
    %cst_24 = arith.constant 5.000000e-01 : f32
    %43 = vector.broadcast %cst_24 : f32 to vector<32x32xf32>
    %44 = arith.addf %43, %42 : vector<32x32xf32>
    %45 = arith.mulf %44, %22 : vector<32x32xf32>
    %46 = arith.mulf %33, %39 : vector<32x32xf32>
    %47 = arith.addf %45, %46 : vector<32x32xf32>
    %48 = math.tanh %47 : vector<32x32xf32>
    %49 = arith.mulf %38, %48 : vector<32x32xf32>
    %c64 = arith.constant 64 : index
    %c0_25 = arith.constant 0 : index
    %50 = vector.load %arg9[%c64, %c0_25] : memref<256x128xf32, #tpu.memory_space<vmem>>, vector<32x128xf32>
    %cst_26 = arith.constant dense<0.000000e+00> : vector<32x128xf32>
    %51 = tpu.matmul %49, %7, %cst_26 {dimension_numbers = #tpu.dot_dimension_numbers<[1], [0], [0], [1], [0, 0, 1, 1], [], []>} : vector<32x32xf32>, vector<32x128xf32>, vector<32x128xf32> -> vector<32x128xf32>
    %52 = arith.addf %50, %51 : vector<32x128xf32>
    %53 = math.tanh %52 : vector<32x128xf32>
    %54 = vector.extract_strided_slice %53 {offsets = [0, 0], sizes = [32, 32], strides = [1, 1]} : vector<32x128xf32> to vector<32x32xf32>
    %cst_27 = arith.constant 5.000000e-01 : f32
    %55 = vector.broadcast %cst_27 : f32 to vector<32x32xf32>
    %56 = arith.mulf %55, %54 : vector<32x32xf32>
    %cst_28 = arith.constant 5.000000e-01 : f32
    %57 = vector.broadcast %cst_28 : f32 to vector<32x32xf32>
    %58 = arith.addf %57, %56 : vector<32x32xf32>
    %59 = vector.extract_strided_slice %53 {offsets = [0, 64], sizes = [32, 32], strides = [1, 1]} : vector<32x128xf32> to vector<32x32xf32>
    %cst_29 = arith.constant 5.000000e-01 : f32
    %60 = vector.broadcast %cst_29 : f32 to vector<32x32xf32>
    %61 = arith.mulf %60, %59 : vector<32x32xf32>
    %cst_30 = arith.constant 5.000000e-01 : f32
    %62 = vector.broadcast %cst_30 : f32 to vector<32x32xf32>
    %63 = arith.addf %62, %61 : vector<32x32xf32>
    %64 = vector.extract_strided_slice %53 {offsets = [0, 96], sizes = [32, 32], strides = [1, 1]} : vector<32x128xf32> to vector<32x32xf32>
    %65 = vector.extract_strided_slice %53 {offsets = [0, 32], sizes = [32, 32], strides = [1, 1]} : vector<32x128xf32> to vector<32x32xf32>
    %cst_31 = arith.constant 5.000000e-01 : f32
    %66 = vector.broadcast %cst_31 : f32 to vector<32x32xf32>
    %67 = arith.mulf %66, %65 : vector<32x32xf32>
    %cst_32 = arith.constant 5.000000e-01 : f32
    %68 = vector.broadcast %cst_32 : f32 to vector<32x32xf32>
    %69 = arith.addf %68, %67 : vector<32x32xf32>
    %70 = arith.mulf %69, %47 : vector<32x32xf32>
    %71 = arith.mulf %58, %64 : vector<32x32xf32>
    %72 = arith.addf %70, %71 : vector<32x32xf32>
    %73 = math.tanh %72 : vector<32x32xf32>
    %74 = arith.mulf %63, %73 : vector<32x32xf32>
    %c96 = arith.constant 96 : index
    %c0_33 = arith.constant 0 : index
    %75 = vector.load %arg9[%c96, %c0_33] : memref<256x128xf32, #tpu.memory_space<vmem>>, vector<32x128xf32>
    %cst_34 = arith.constant dense<0.000000e+00> : vector<32x128xf32>
    %76 = tpu.matmul %74, %7, %cst_34 {dimension_numbers = #tpu.dot_dimension_numbers<[1], [0], [0], [1], [0, 0, 1, 1], [], []>} : vector<32x32xf32>, vector<32x128xf32>, vector<32x128xf32> -> vector<32x128xf32>
    %77 = arith.addf %75, %76 : vector<32x128xf32>
    %78 = math.tanh %77 : vector<32x128xf32>
    %79 = vector.extract_strided_slice %78 {offsets = [0, 0], sizes = [32, 32], strides = [1, 1]} : vector<32x128xf32> to vector<32x32xf32>
    %cst_35 = arith.constant 5.000000e-01 : f32
    %80 = vector.broadcast %cst_35 : f32 to vector<32x32xf32>
    %81 = arith.mulf %80, %79 : vector<32x32xf32>
    %cst_36 = arith.constant 5.000000e-01 : f32
    %82 = vector.broadcast %cst_36 : f32 to vector<32x32xf32>
    %83 = arith.addf %82, %81 : vector<32x32xf32>
    %84 = vector.extract_strided_slice %78 {offsets = [0, 64], sizes = [32, 32], strides = [1, 1]} : vector<32x128xf32> to vector<32x32xf32>
    %cst_37 = arith.constant 5.000000e-01 : f32
    %85 = vector.broadcast %cst_37 : f32 to vector<32x32xf32>
    %86 = arith.mulf %85, %84 : vector<32x32xf32>
    %cst_38 = arith.constant 5.000000e-01 : f32
    %87 = vector.broadcast %cst_38 : f32 to vector<32x32xf32>
    %88 = arith.addf %87, %86 : vector<32x32xf32>
    %89 = vector.extract_strided_slice %78 {offsets = [0, 96], sizes = [32, 32], strides = [1, 1]} : vector<32x128xf32> to vector<32x32xf32>
    %90 = vector.extract_strided_slice %78 {offsets = [0, 32], sizes = [32, 32], strides = [1, 1]} : vector<32x128xf32> to vector<32x32xf32>
    %cst_39 = arith.constant 5.000000e-01 : f32
    %91 = vector.broadcast %cst_39 : f32 to vector<32x32xf32>
    %92 = arith.mulf %91, %90 : vector<32x32xf32>
    %cst_40 = arith.constant 5.000000e-01 : f32
    %93 = vector.broadcast %cst_40 : f32 to vector<32x32xf32>
    %94 = arith.addf %93, %92 : vector<32x32xf32>
    %95 = arith.mulf %94, %72 : vector<32x32xf32>
    %96 = arith.mulf %83, %89 : vector<32x32xf32>
    %97 = arith.addf %95, %96 : vector<32x32xf32>
    %98 = math.tanh %97 : vector<32x32xf32>
    %99 = arith.mulf %88, %98 : vector<32x32xf32>
    %100 = tpu.concatenate %24, %49, %74, %99 in 0 : vector<32x32xf32>, vector<32x32xf32>, vector<32x32xf32>, vector<32x32xf32> -> vector<128x32xf32>
    %cst_41 = arith.constant dense<0.000000e+00> : vector<32x128xf32>
    %101 = tpu.matmul %8, %100, %cst_41 {dimension_numbers = #tpu.dot_dimension_numbers<[1], [1], [0], [0], [0, 0, 1, 0], [], []>} : vector<32x32xf32>, vector<128x32xf32>, vector<32x128xf32> -> vector<32x128xf32>
    %c0_42 = arith.constant 0 : index
    %c0_43 = arith.constant 0 : index
    %102 = vector.load %arg6[%c0_42, %c0_43] : memref<32x256xf32, #tpu.memory_space<vmem>>, vector<32x128xf32>
    tpu.vector_store %arg6[%c0_42, %c0_43], %101 {strides = array<i32>} : memref<32x256xf32, #tpu.memory_space<vmem>>, vector<32x128xf32>,
    %c128 = arith.constant 128 : index
    %c0_44 = arith.constant 0 : index
    %103 = vector.load %arg9[%c128, %c0_44] : memref<256x128xf32, #tpu.memory_space<vmem>>, vector<32x128xf32>
    %cst_45 = arith.constant dense<0.000000e+00> : vector<32x128xf32>
    %104 = tpu.matmul %99, %7, %cst_45 {dimension_numbers = #tpu.dot_dimension_numbers<[1], [0], [0], [1], [0, 0, 1, 1], [], []>} : vector<32x32xf32>, vector<32x128xf32>, vector<32x128xf32> -> vector<32x128xf32>
    %105 = arith.addf %103, %104 : vector<32x128xf32>
    %106 = math.tanh %105 : vector<32x128xf32>
    %107 = vector.extract_strided_slice %106 {offsets = [0, 0], sizes = [32, 32], strides = [1, 1]} : vector<32x128xf32> to vector<32x32xf32>
    %cst_46 = arith.constant 5.000000e-01 : f32
    %108 = vector.broadcast %cst_46 : f32 to vector<32x32xf32>
    %109 = arith.mulf %108, %107 : vector<32x32xf32>
    %cst_47 = arith.constant 5.000000e-01 : f32
    %110 = vector.broadcast %cst_47 : f32 to vector<32x32xf32>
    %111 = arith.addf %110, %109 : vector<32x32xf32>
    %112 = vector.extract_strided_slice %106 {offsets = [0, 64], sizes = [32, 32], strides = [1, 1]} : vector<32x128xf32> to vector<32x32xf32>
    %cst_48 = arith.constant 5.000000e-01 : f32
    %113 = vector.broadcast %cst_48 : f32 to vector<32x32xf32>
    %114 = arith.mulf %113, %112 : vector<32x32xf32>
    %cst_49 = arith.constant 5.000000e-01 : f32
    %115 = vector.broadcast %cst_49 : f32 to vector<32x32xf32>
    %116 = arith.addf %115, %114 : vector<32x32xf32>
    %117 = vector.extract_strided_slice %106 {offsets = [0, 96], sizes = [32, 32], strides = [1, 1]} : vector<32x128xf32> to vector<32x32xf32>
    %118 = vector.extract_strided_slice %106 {offsets = [0, 32], sizes = [32, 32], strides = [1, 1]} : vector<32x128xf32> to vector<32x32xf32>
    %cst_50 = arith.constant 5.000000e-01 : f32
    %119 = vector.broadcast %cst_50 : f32 to vector<32x32xf32>
    %120 = arith.mulf %119, %118 : vector<32x32xf32>
    %cst_51 = arith.constant 5.000000e-01 : f32
    %121 = vector.broadcast %cst_51 : f32 to vector<32x32xf32>
    %122 = arith.addf %121, %120 : vector<32x32xf32>
    %123 = arith.mulf %122, %97 : vector<32x32xf32>
    %124 = arith.mulf %111, %117 : vector<32x32xf32>
    %125 = arith.addf %123, %124 : vector<32x32xf32>
    %126 = math.tanh %125 : vector<32x32xf32>
    %127 = arith.mulf %116, %126 : vector<32x32xf32>
    %c160 = arith.constant 160 : index
    %c0_52 = arith.constant 0 : index
    %128 = vector.load %arg9[%c160, %c0_52] : memref<256x128xf32, #tpu.memory_space<vmem>>, vector<32x128xf32>
    %cst_53 = arith.constant dense<0.000000e+00> : vector<32x128xf32>
    %129 = tpu.matmul %127, %7, %cst_53 {dimension_numbers = #tpu.dot_dimension_numbers<[1], [0], [0], [1], [0, 0, 1, 1], [], []>} : vector<32x32xf32>, vector<32x128xf32>, vector<32x128xf32> -> vector<32x128xf32>
    %130 = arith.addf %128, %129 : vector<32x128xf32>
    %131 = math.tanh %130 : vector<32x128xf32>
    %132 = vector.extract_strided_slice %131 {offsets = [0, 0], sizes = [32, 32], strides = [1, 1]} : vector<32x128xf32> to vector<32x32xf32>
    %cst_54 = arith.constant 5.000000e-01 : f32
    %133 = vector.broadcast %cst_54 : f32 to vector<32x32xf32>
    %134 = arith.mulf %133, %132 : vector<32x32xf32>
    %cst_55 = arith.constant 5.000000e-01 : f32
    %135 = vector.broadcast %cst_55 : f32 to vector<32x32xf32>
    %136 = arith.addf %135, %134 : vector<32x32xf32>
    %137 = vector.extract_strided_slice %131 {offsets = [0, 64], sizes = [32, 32], strides = [1, 1]} : vector<32x128xf32> to vector<32x32xf32>
    %cst_56 = arith.constant 5.000000e-01 : f32
    %138 = vector.broadcast %cst_56 : f32 to vector<32x32xf32>
    %139 = arith.mulf %138, %137 : vector<32x32xf32>
    %cst_57 = arith.constant 5.000000e-01 : f32
    %140 = vector.broadcast %cst_57 : f32 to vector<32x32xf32>
    %141 = arith.addf %140, %139 : vector<32x32xf32>
    %142 = vector.extract_strided_slice %131 {offsets = [0, 96], sizes = [32, 32], strides = [1, 1]} : vector<32x128xf32> to vector<32x32xf32>
    %143 = vector.extract_strided_slice %131 {offsets = [0, 32], sizes = [32, 32], strides = [1, 1]} : vector<32x128xf32> to vector<32x32xf32>
    %cst_58 = arith.constant 5.000000e-01 : f32
    %144 = vector.broadcast %cst_58 : f32 to vector<32x32xf32>
    %145 = arith.mulf %144, %143 : vector<32x32xf32>
    %cst_59 = arith.constant 5.000000e-01 : f32
    %146 = vector.broadcast %cst_59 : f32 to vector<32x32xf32>
    %147 = arith.addf %146, %145 : vector<32x32xf32>
    %148 = arith.mulf %147, %125 : vector<32x32xf32>
    %149 = arith.mulf %136, %142 : vector<32x32xf32>
    %150 = arith.addf %148, %149 : vector<32x32xf32>
    %151 = math.tanh %150 : vector<32x32xf32>
    %152 = arith.mulf %141, %151 : vector<32x32xf32>
    %c192 = arith.constant 192 : index
    %c0_60 = arith.constant 0 : index
    %153 = vector.load %arg9[%c192, %c0_60] : memref<256x128xf32, #tpu.memory_space<vmem>>, vector<32x128xf32>
    %cst_61 = arith.constant dense<0.000000e+00> : vector<32x128xf32>
    %154 = tpu.matmul %152, %7, %cst_61 {dimension_numbers = #tpu.dot_dimension_numbers<[1], [0], [0], [1], [0, 0, 1, 1], [], []>} : vector<32x32xf32>, vector<32x128xf32>, vector<32x128xf32> -> vector<32x128xf32>
    %155 = arith.addf %153, %154 : vector<32x128xf32>
    %156 = math.tanh %155 : vector<32x128xf32>
    %157 = vector.extract_strided_slice %156 {offsets = [0, 0], sizes = [32, 32], strides = [1, 1]} : vector<32x128xf32> to vector<32x32xf32>
    %cst_62 = arith.constant 5.000000e-01 : f32
    %158 = vector.broadcast %cst_62 : f32 to vector<32x32xf32>
    %159 = arith.mulf %158, %157 : vector<32x32xf32>
    %cst_63 = arith.constant 5.000000e-01 : f32
    %160 = vector.broadcast %cst_63 : f32 to vector<32x32xf32>
    %161 = arith.addf %160, %159 : vector<32x32xf32>
    %162 = vector.extract_strided_slice %156 {offsets = [0, 64], sizes = [32, 32], strides = [1, 1]} : vector<32x128xf32> to vector<32x32xf32>
    %cst_64 = arith.constant 5.000000e-01 : f32
    %163 = vector.broadcast %cst_64 : f32 to vector<32x32xf32>
    %164 = arith.mulf %163, %162 : vector<32x32xf32>
    %cst_65 = arith.constant 5.000000e-01 : f32
    %165 = vector.broadcast %cst_65 : f32 to vector<32x32xf32>
    %166 = arith.addf %165, %164 : vector<32x32xf32>
    %167 = vector.extract_strided_slice %156 {offsets = [0, 96], sizes = [32, 32], strides = [1, 1]} : vector<32x128xf32> to vector<32x32xf32>
    %168 = vector.extract_strided_slice %156 {offsets = [0, 32], sizes = [32, 32], strides = [1, 1]} : vector<32x128xf32> to vector<32x32xf32>
    %cst_66 = arith.constant 5.000000e-01 : f32
    %169 = vector.broadcast %cst_66 : f32 to vector<32x32xf32>
    %170 = arith.mulf %169, %168 : vector<32x32xf32>
    %cst_67 = arith.constant 5.000000e-01 : f32
    %171 = vector.broadcast %cst_67 : f32 to vector<32x32xf32>
    %172 = arith.addf %171, %170 : vector<32x32xf32>
    %173 = arith.mulf %172, %150 : vector<32x32xf32>
    %174 = arith.mulf %161, %167 : vector<32x32xf32>
    %175 = arith.addf %173, %174 : vector<32x32xf32>
    %176 = math.tanh %175 : vector<32x32xf32>
    %177 = arith.mulf %166, %176 : vector<32x32xf32>
    %c224 = arith.constant 224 : index
    %c0_68 = arith.constant 0 : index
    %178 = vector.load %arg9[%c224, %c0_68] : memref<256x128xf32, #tpu.memory_space<vmem>>, vector<32x128xf32>
    %cst_69 = arith.constant dense<0.000000e+00> : vector<32x128xf32>
    %179 = tpu.matmul %177, %7, %cst_69 {dimension_numbers = #tpu.dot_dimension_numbers<[1], [0], [0], [1], [0, 0, 1, 1], [], []>} : vector<32x32xf32>, vector<32x128xf32>, vector<32x128xf32> -> vector<32x128xf32>
    %180 = arith.addf %178, %179 : vector<32x128xf32>
    %181 = math.tanh %180 : vector<32x128xf32>
    %182 = vector.extract_strided_slice %181 {offsets = [0, 0], sizes = [32, 32], strides = [1, 1]} : vector<32x128xf32> to vector<32x32xf32>
    %cst_70 = arith.constant 5.000000e-01 : f32
    %183 = vector.broadcast %cst_70 : f32 to vector<32x32xf32>
    %184 = arith.mulf %183, %182 : vector<32x32xf32>
    %cst_71 = arith.constant 5.000000e-01 : f32
    %185 = vector.broadcast %cst_71 : f32 to vector<32x32xf32>
    %186 = arith.addf %185, %184 : vector<32x32xf32>
    %187 = vector.extract_strided_slice %181 {offsets = [0, 64], sizes = [32, 32], strides = [1, 1]} : vector<32x128xf32> to vector<32x32xf32>
    %cst_72 = arith.constant 5.000000e-01 : f32
    %188 = vector.broadcast %cst_72 : f32 to vector<32x32xf32>
    %189 = arith.mulf %188, %187 : vector<32x32xf32>
    %cst_73 = arith.constant 5.000000e-01 : f32
    %190 = vector.broadcast %cst_73 : f32 to vector<32x32xf32>
    %191 = arith.addf %190, %189 : vector<32x32xf32>
    %192 = vector.extract_strided_slice %181 {offsets = [0, 96], sizes = [32, 32], strides = [1, 1]} : vector<32x128xf32> to vector<32x32xf32>
    %193 = vector.extract_strided_slice %181 {offsets = [0, 32], sizes = [32, 32], strides = [1, 1]} : vector<32x128xf32> to vector<32x32xf32>
    %cst_74 = arith.constant 5.000000e-01 : f32
    %194 = vector.broadcast %cst_74 : f32 to vector<32x32xf32>
    %195 = arith.mulf %194, %193 : vector<32x32xf32>
    %cst_75 = arith.constant 5.000000e-01 : f32
    %196 = vector.broadcast %cst_75 : f32 to vector<32x32xf32>
    %197 = arith.addf %196, %195 : vector<32x32xf32>
    %198 = arith.mulf %197, %175 : vector<32x32xf32>
    %199 = arith.mulf %186, %192 : vector<32x32xf32>
    %200 = arith.addf %198, %199 : vector<32x32xf32>
    %201 = math.tanh %200 : vector<32x32xf32>
    %202 = arith.mulf %191, %201 : vector<32x32xf32>
    %203 = tpu.concatenate %127, %152, %177, %202 in 0 : vector<32x32xf32>, vector<32x32xf32>, vector<32x32xf32>, vector<32x32xf32> -> vector<128x32xf32>
    %cst_76 = arith.constant dense<0.000000e+00> : vector<32x128xf32>
    %204 = tpu.matmul %8, %203, %cst_76 {dimension_numbers = #tpu.dot_dimension_numbers<[1], [1], [0], [0], [0, 0, 1, 0], [], []>} : vector<32x32xf32>, vector<128x32xf32>, vector<32x128xf32> -> vector<32x128xf32>
    %c0_77 = arith.constant 0 : index
    %c128_78 = arith.constant 128 : index
    %205 = vector.load %arg6[%c0_77, %c128_78] : memref<32x256xf32, #tpu.memory_space<vmem>>, vector<32x128xf32>
    tpu.vector_store %arg6[%c0_77, %c128_78], %204 {strides = array<i32>} : memref<32x256xf32, #tpu.memory_space<vmem>>, vector<32x128xf32>,
    %cst_79 = arith.constant dense<0.000000e+00> : vector<32x32xf32>
    %206 = tpu.matmul %8, %202, %cst_79 {dimension_numbers = #tpu.dot_dimension_numbers<[1], [1], [0], [0], [0, 0, 1, 0], [], []>} : vector<32x32xf32>, vector<32x32xf32>, vector<32x32xf32> -> vector<32x32xf32>
    %c0_80 = arith.constant 0 : index
    %c0_81 = arith.constant 0 : index
    %207 = vector.load %arg7[%c0_80, %c0_81] : memref<32x32xf32, #tpu.memory_space<vmem>>, vector<32x32xf32>
    tpu.vector_store %arg7[%c0_80, %c0_81], %206 {strides = array<i32>} : memref<32x32xf32, #tpu.memory_space<vmem>>, vector<32x32xf32>,
    %cst_82 = arith.constant dense<0.000000e+00> : vector<32x32xf32>
    %208 = tpu.matmul %8, %200, %cst_82 {dimension_numbers = #tpu.dot_dimension_numbers<[1], [1], [0], [0], [0, 0, 1, 0], [], []>} : vector<32x32xf32>, vector<32x32xf32>, vector<32x32xf32> -> vector<32x32xf32>
    %c0_83 = arith.constant 0 : index
    %c0_84 = arith.constant 0 : index
    %209 = vector.load %arg8[%c0_83, %c0_84] : memref<32x32xf32, #tpu.memory_space<vmem>>, vector<32x32xf32>
    tpu.vector_store %arg8[%c0_83, %c0_84], %208 {strides = array<i32>} : memref<32x32xf32, #tpu.memory_space<vmem>>, vector<32x32xf32>,
    return
  }
  func.func @transform_0(%arg0: i32) -> (i32, i32) {
    %c0_i32 = arith.constant 0 : i32
    %c0_i32_0 = arith.constant 0 : i32
    %c0_i32_1 = arith.constant 0 : i32
    return %c0_i32, %c0_i32_0 : i32, i32
  }
  func.func @transform_1(%arg0: i32) -> (i32, i32) {
    %c0_i32 = arith.constant 0 : i32
    %c0_i32_0 = arith.constant 0 : i32
    %c0_i32_1 = arith.constant 0 : i32
    return %c0_i32, %c0_i32_0 : i32, i32
  }
  func.func @transform_2(%arg0: i32) -> (i32, i32) {
    %c0_i32 = arith.constant 0 : i32
    %c0_i32_0 = arith.constant 0 : i32
    %c0_i32_1 = arith.constant 0 : i32
    return %c0_i32, %c0_i32_0 : i32, i32
  }
  func.func @transform_3(%arg0: i32) -> (i32, i32) {
    %c0_i32 = arith.constant 0 : i32
    %c0_i32_0 = arith.constant 0 : i32
    %c0_i32_1 = arith.constant 0 : i32
    return %c0_i32, %c0_i32_0 : i32, i32
  }
  func.func @transform_4(%arg0: i32) -> (i32, i32) {
    %c0_i32 = arith.constant 0 : i32
    %c0_i32_0 = arith.constant 0 : i32
    %c0_i32_1 = arith.constant 0 : i32
    return %c0_i32, %c0_i32_0 : i32, i32
  }
  func.func @transform_5(%arg0: i32) -> (i32, i32) {
    %c0_i32 = arith.constant 0 : i32
    %c0_i32_0 = arith.constant 0 : i32
    %c0_i32_1 = arith.constant 0 : i32
    return %c0_i32, %c0_i32_0 : i32, i32
  }
  func.func @transform_6(%arg0: i32) -> (i32, i32) {
    %c0_i32 = arith.constant 0 : i32
    %c0_i32_0 = arith.constant 0 : i32
    %c0_i32_1 = arith.constant 0 : i32
    return %c0_i32, %c0_i32_0 : i32, i32
  }
  func.func @transform_7(%arg0: i32) -> (i32, i32) {
    %c0_i32 = arith.constant 0 : i32
    %c0_i32_0 = arith.constant 0 : i32
    %c0_i32_1 = arith.constant 0 : i32
    return %c0_i32, %c0_i32_0 : i32, i32
  }
}

</mosaic_0001>

<bundles_post_ra>
// kernel: lstm_forward_prepared.1
= control target key start
LH: loop header
LB: loop body
LE: loop exit
PB: predicated region body
PF: predicated region fallthrough
CT: control target
= control target key end

     0   :  { %13 = vsyncpa [#allocation4], 0  ;;  %s2671_s0 = inlined_call_operand.vmem [shape: f32[256,32], index: 0, kind: input, shape index: {}]   ;;  %s2672_s1 = inlined_call_operand.vmem [shape: f32[32,128], index: 1, kind: input, shape index: {}]   ;;  %s2673_s2 = inlined_call_operand.vmem [shape: f32[32,128], index: 2, kind: input, shape index: {}]   ;;  %s2674_s3 = inlined_call_operand.vmem [shape: f32[1,128], index: 3, kind: input, shape index: {}]   ;;  %s2675_s4 = inlined_call_operand.vmem [shape: f32[32,32], index: 4, kind: input, shape index: {}]   ;;  %s2676_s5 = inlined_call_operand.vmem [shape: f32[32,256], index: 5, kind: output, shape index: {0}]   ;;  %s2677_s6 = inlined_call_operand.hbm [shape: f32[32,32], index: 6, kind: output, shape index: {1}]   ;;  %s2678_s7 = inlined_call_operand.hbm [shape: f32[32,32], index: 7, kind: output, shape index: {2}]  }
   0x1   :  { %v60_v0 = vld [vmem:[%s2672_s1 + $0x18] sm:$0xff]  ;;  %v59_v1 = vld [vmem:[%s2672_s1 + $0x10] sm:$0xff]  ;;  %v58_v2 = vld [vmem:[%s2672_s1 + $0x8] sm:$0xff] }
   0x2   :  { %174 = vmatpush.msra.mxu0 %v60_v0  ;;  %1690 = vmatpush.msra.mxu1 %v60_v0 }
   0x3   :  { %1691 = vmatpush.msra.mxu2 %v60_v0  ;;  %1692 = vmatpush.msra.mxu3 %v60_v0 }
   0x4   :  { %175 = vmatpush.msra.mxu0 %v59_v1  ;;  %1693 = vmatpush.msra.mxu1 %v59_v1 }
   0x5   :  { %14 = vsyncpa [#allocation6], 0  ;;  %v57_v3 = vld [vmem:[%s2672_s1] sm:$0xff]  ;;  %1694 = vmatpush.msra.mxu2 %v59_v1  ;;  %1695 = vmatpush.msra.mxu3 %v59_v1  ;;  %vm65_vm0 = vcmask 261120   ;;  %v26_v5 = vld [vmem:[%s2671_s0 + $0x8] sm:$0xff]  ;;  %s1891_s18 = smov 32  }
   0x6   :  { %176 = vmatpush.msra.mxu0 %v58_v2  ;;  %v25_v4 = vld [vmem:[%s2671_s0] sm:$0xff]  ;;  %1696 = vmatpush.msra.mxu1 %v58_v2  ;;  %v27_v6 = vld [vmem:[%s2671_s0 + $0x10] sm:$0xff]  ;;  %v28_v7 = vld [vmem:[%s2671_s0 + $0x18] sm:$0xff]  ;;  %s1892_s19 = smov 64   ;;  %s1894_s29 = smov [#allocation3]  }
   0x7   :  { %1697 = vmatpush.msra.mxu2 %v58_v2  ;;  %1698 = vmatpush.msra.mxu3 %v58_v2  ;;  %v1969_v8 = vld [vmem:[%s2674_s3] ss:$0 sm:$0xff]  ;;  %v46_v45 = vld [vmem:[%s2671_s0 + $0xa8] sm:$0xff]  ;;  %v2003_v46 = vld [vmem:[%s2673_s2 + $0x18] sm:$0xff]  ;;  %s1540_s30 = sshll.u32 %s1894_s29, 4  ;;  %s1542_s9 = sshll.u32 %s2677_s6, 4  ;;  %s1541_s30 = int_to_ptr.vmem [resolvable:$true] %s1540_s30  ;;  %s1543_s9 = int_to_ptr.hbm [resolvable:$true] %s1542_s9 }
   0x8   :  { %177 = vmatpush.msra.mxu0 %v57_v3  ;;  %1699 = vmatpush.msra.mxu1 %v57_v3  ;;  %v2009_v47 = vld [vmem:[%s2673_s2 + $0x10] sm:$0xff]  ;;  %v29_v48 = vld [vmem:[%s2671_s0 + $0x20] sm:$0xff]  ;;  %v2020_v49 = vld [vmem:[%s2673_s2 + $0x8] sm:$0xff]  ;;  %s1895_s10 = smov [#allocation5]   ;;  %s1896_s13 = smov 128  }
   0x9   :  { %1574 = vmatmul.msk.f32.vlgmr.msra.gmra.mxu0 %vm65_vm0, %v25_v4  ;;  %1700 = vmatpush.msra.mxu2 %v57_v3  ;;  %v2028_v50 = vld [vmem:[%s2673_s2] sm:$0xff]  ;;  %v30_v55 = vld [vmem:[%s2671_s0 + $0x28] sm:$0xff]  ;;  %v31_v57 = vld [vmem:[%s2671_s0 + $0x30] sm:$0xff]  ;;  %s1553_s11 = sshll.u32 %s1895_s10, 4  ;;  %s1554_s11 = int_to_ptr.vmem [resolvable:$true] %s1553_s11 }
   0xa   :  { %1701 = vmatpush.msra.mxu3 %v57_v3  ;;  %1595 = vmatmul.msk.f32.vlgmr.msra.gmra.mxu1 %vm65_vm0, %v46_v45  ;;  %v32_v59 = vld [vmem:[%s2671_s0 + $0x38] sm:$0xff] }
   0xb   :  { %564 = vmatpush.msrb.mxu2 %v2003_v46  ;;  %411 = vmatpush.msrb.mxu1 %v2003_v46 }
   0xc   :  { %701 = vmatpush.msrb.mxu3 %v2003_v46 }
   0xd   :  { %565 = vmatpush.msrb.mxu2 %v2009_v47  ;;  %412 = vmatpush.msrb.mxu1 %v2009_v47 }
   0xe   :  { %702 = vmatpush.msrb.mxu3 %v2009_v47 }
   0xf   :  { %566 = vmatpush.msrb.mxu2 %v2020_v49  ;;  %413 = vmatpush.msrb.mxu1 %v2020_v49 }
  0x10   :  { %703 = vmatpush.msrb.mxu3 %v2020_v49 }
  0x11   :  { %1575 = vmatmul.msk.f32.gmra.mxu0 %vm65_vm0, %v26_v5  ;;  %567 = vmatpush.msrb.mxu2 %v2028_v50 }
  0x12   :  { %414 = vmatpush.msrb.mxu1 %v2028_v50  ;;  %704 = vmatpush.msrb.mxu3 %v2028_v50 }
  0x19   :  { %1576 = vmatmul.msk.f32.gmra.mxu0 %vm65_vm0, %v27_v6 }
  0x21   :  { %1577 = vmatmul.msk.f32.gmra.mxu0 %vm65_vm0, %v28_v7 }
  0x29   :  { %1578 = vmatmul.msk.f32.gmra.mxu0 %vm65_vm0, %v29_v48 }
  0x31   :  { %1579 = vmatmul.msk.f32.gmra.mxu0 %vm65_vm0, %v30_v55 }
  0x39   :  { %1580 = vmatmul.msk.f32.gmra.mxu0 %vm65_vm0, %v31_v57 }
  0x41   :  { %1581 = vmatmul.msk.f32.gmra.mxu0 %vm65_vm0, %v32_v59 }
  0x86   :  { %v179_v9 = vpop.f32.mrf.mxu0 }
  0x87   :  { %v180_v10 = vadd.f32 %v1969_v8, %v179_v9  ;;  %v2067_v62 = vpop.f32.mrf.mxu1 }
  0x89   :  { %1710 = vtanh.f32 %v180_v10 }
  0x8e   :  { %v182_v11 = vpop.f32.mrf.mxu0 }
  0x8f   :  { %v1711_v12 = vpop.eup %1710  ;;  %v183_v13 = vadd.f32 %v1969_v8, %v182_v11 }
  0x90   :  { %335 = vrot.lane.b32.xlu0 %v1711_v12, %s1891_s18  ;;  %v323_v21 = vmul.f32 0.5, %v1711_v12 }
  0x91   :  { %1712 = vtanh.f32 %v183_v13 }
  0x92   :  { %v327_v22 = vadd.f32 0.5, %v323_v21 }
  0x96   :  { %v185_v14 = vpop.f32.mrf.mxu0 }
  0x97   :  { %v1713_v15 = vpop.eup %1712  ;;  %v186_v16 = vadd.f32 %v1969_v8, %v185_v14 }
  0x98   :  { %337 = vrot.lane.b32.xlu0 %v1713_v15, %s1891_s18  ;;  %v324_v25 = vmul.f32 0.5, %v1713_v15 }
  0x99   :  { %1714 = vtanh.f32 %v186_v16 }
  0x9a   :  { %v328_v26 = vadd.f32 0.5, %v324_v25 }
  0x9e   :  { %v188_v17 = vpop.f32.mrf.mxu0 }
  0x9f   :  { %v1715_v18 = vpop.eup %1714  ;;  %v189_v19 = vadd.f32 %v1969_v8, %v188_v17 }
  0xa0   :  { %339 = vrot.lane.b32.xlu1 %v1715_v18, %s1891_s18  ;;  %v325_v30 = vmul.f32 0.5, %v1715_v18 }
  0xa1   :  { %1716 = vtanh.f32 %v189_v19 }
  0xa2   :  { %v329_v31 = vadd.f32 0.5, %v325_v30 }
  0xa6   :  { %v191_v63 = vpop.f32.mrf.mxu0 }
  0xa7   :  { %v1717_v20 = vpop.eup %1716  ;;  %v192_v0 = vadd.f32 %v1969_v8, %v191_v63 }
  0xa8   :  { %341 = vrot.lane.b32.xlu1 %v1717_v20, %s1891_s18  ;;  %v326_v35 = vmul.f32 0.5, %v1717_v20 }
  0xaa   :  { %v330_v36 = vadd.f32 0.5, %v326_v35 }
  0xae   :  { %v194_v4 = vpop.f32.mrf.mxu0 }
  0xaf   :  { %v195_v5 = vadd.f32 %v1969_v8, %v194_v4 }
  0xb6   :  { %v197_v10 = vpop.f32.mrf.mxu0 }
  0xb7   :  { %v198_v11 = vadd.f32 %v1969_v8, %v197_v10  ;;  %v49_v10 = vld [vmem:[%s2671_s0 + $0xc0] sm:$0xff] }
  0xbe   :  { %v200_v14 = vpop.f32.mrf.mxu0 }
  0xbf   :  { %v201_v15 = vadd.f32 %v1969_v8, %v200_v14  ;;  %v51_v14 = vld [vmem:[%s2671_s0 + $0xd0] sm:$0xff] }
 0x102   :  { %v336_v23 = vpop.permute.xlu0 %335 }
 0x103   :  { %v1979_v24 = vmul.f32 %v336_v23, %v327_v22 }
 0x105   :  { %1718 = vtanh.f32 %v1979_v24 }
 0x10a   :  { %v338_v27 = vpop.permute.xlu0 %337 }
 0x10b   :  { %v1719_v28 = vpop.eup %1718  ;;  %v1982_v29 = vmul.f32 %v338_v27, %v328_v26 }
 0x10c   :  { %359 = vrot.lane.b32.xlu2 %v1719_v28, %s1892_s19 }
 0x10d   :  { %1720 = vtanh.f32 %v1982_v29 }
 0x112   :  { %v340_v32 = vpop.permute.xlu1 %339 }
 0x113   :  { %v1721_v33 = vpop.eup %1720  ;;  %v1986_v34 = vmul.f32 %v340_v32, %v329_v31 }
 0x114   :  { %361 = vrot.lane.b32.xlu2 %v1721_v33, %s1892_s19 }
 0x115   :  { %1722 = vtanh.f32 %v1986_v34 }
 0x11a   :  { %v342_v37 = vpop.permute.xlu1 %341 }
 0x11b   :  { %v1723_v38 = vpop.eup %1722  ;;  %v1990_v39 = vmul.f32 %v342_v37, %v330_v36 }
 0x11c   :  { %363 = vrot.lane.b32.xlu0 %v1723_v38, %s1892_s19 }
 0x11d   :  { %1724 = vtanh.f32 %v1990_v39 }
 0x123   :  { %v1725_v40 = vpop.eup %1724 }
 0x124   :  { %365 = vrot.lane.b32.xlu1 %v1725_v40, %s1892_s19 }
 0x166   :  { %v360_v41 = vpop.permute.xlu2 %359 }
 0x167   :  { %v371_v42 = vmul.f32 %v360_v41, %v327_v22 }
 0x169   :  { %383 = vrot.lane.b32.xlu2 %v371_v42, %s1892_s19 }
 0x16e   :  { %v362_v43 = vpop.permute.xlu2 %361 }
 0x16f   :  { %v372_v44 = vmul.f32 %v362_v43, %v328_v26 }
 0x171   :  { %385 = vrot.lane.b32.xlu0 %v372_v44, %s1892_s19 }
 0x18e   :  { %v364_v51 = vpop.permute.xlu0 %363 }
 0x18f   :  { %v373_v52 = vmul.f32 %v364_v51, %v329_v31 }
 0x191   :  { %387 = vrot.lane.b32.xlu1 %v373_v52, %s1892_s19 }
 0x196   :  { %v366_v53 = vpop.permute.xlu1 %365 }
 0x197   :  { %v374_v54 = vmul.f32 %v366_v53, %v330_v36 }
 0x199   :  { %389 = vrot.lane.b32.xlu2 %v374_v54, %s1892_s19 }
 0x1c3   :  { %v2043_v56 = vpop.permute.xlu2 %383 }
 0x1c4   :  { %1606 = vmatmul.msk.f32.vlgmr.msrb.gmra.mxu1 %vm65_vm0, %v2043_v56 }
 0x1e3   :  { %v2051_v58 = vpop.permute.xlu0 %385 }
 0x1e4   :  { %1607 = vmatmul.msk.f32.gmra.mxu1 %vm65_vm0, %v2051_v58 }
 0x1f3   :  { %v2063_v61 = vpop.permute.xlu2 %389 }
 0x203   :  { %v2059_v60 = vpop.permute.xlu1 %387 }
 0x204   :  { %1608 = vmatmul.msk.f32.gmra.mxu1 %vm65_vm0, %v2059_v60 }
 0x20c   :  { %1609 = vmatmul.msk.f32.gmra.mxu1 %vm65_vm0, %v2063_v61 }
 0x241   :  { %v416_v1 = vpop.f32.mrf.mxu1 }
 0x242   :  { %v428_v2 = vadd.f32 %v416_v1, %v192_v0 }
 0x244   :  { %1726 = vtanh.f32 %v428_v2 }
 0x24a   :  { %v1727_v3 = vpop.eup %1726 }
 0x24b   :  { %468 = vrot.lane.b32.xlu0 %v1727_v3, %s1891_s18  ;;  %v436_v20 = vmul.f32 0.5, %v1727_v3 }
 0x24d   :  { %v440_v21 = vadd.f32 0.5, %v436_v20 }
 0x261   :  { %v419_v6 = vpop.f32.mrf.mxu1 }
 0x262   :  { %v429_v7 = vadd.f32 %v419_v6, %v195_v5  ;;  %v47_v5 = vld [vmem:[%s2671_s0 + $0xb0] sm:$0xff]  ;;  %v48_v6 = vld [vmem:[%s2671_s0 + $0xb8] sm:$0xff] }
 0x263   :  { %1596 = vmatmul.msk.f32.vlgmr.msra.gmra.mxu2 %vm65_vm0, %v47_v5 }
 0x264   :  { %1728 = vtanh.f32 %v429_v7  ;;  %883 = vmatpush.msra.mxu2 %v2003_v46 }
 0x266   :  { %884 = vmatpush.msra.mxu2 %v2009_v47 }
 0x268   :  { %885 = vmatpush.msra.mxu2 %v2020_v49 }
 0x26a   :  { %v1729_v9 = vpop.eup %1728  ;;  %886 = vmatpush.msra.mxu2 %v2028_v50 }
 0x26b   :  { %470 = vrot.lane.b32.xlu1 %v1729_v9, %s1891_s18  ;;  %1597 = vmatmul.msk.f32.gmra.mxu2 %vm65_vm0, %v48_v6 }
 0x273   :  { %448 = vrot.lane.b32.xlu1 %v1979_v24, %s1891_s18  ;;  %v437_v24 = vmul.f32 0.5, %v1729_v9  ;;  %1598 = vmatmul.msk.f32.gmra.mxu2 %vm65_vm0, %v49_v10 }
 0x275   :  { %v441_v25 = vadd.f32 0.5, %v437_v24 }
 0x281   :  { %v422_v12 = vpop.f32.mrf.mxu1 }
 0x282   :  { %v430_v13 = vadd.f32 %v422_v12, %v198_v11  ;;  %v50_v11 = vld [vmem:[%s2671_s0 + $0xc8] sm:$0xff] }
 0x283   :  { %1599 = vmatmul.msk.f32.gmra.mxu2 %vm65_vm0, %v50_v11 }
 0x284   :  { %1730 = vtanh.f32 %v430_v13 }
 0x289   :  { %v425_v16 = vpop.f32.mrf.mxu1 }
 0x28a   :  { %v1731_v17 = vpop.eup %1730  ;;  %v431_v18 = vadd.f32 %v425_v16, %v201_v15  ;;  %v33_v15 = vld [vmem:[%s2671_s0 + $0x40] sm:$0xff] }
 0x28b   :  { %472 = vrot.lane.b32.xlu2 %v1731_v17, %s1891_s18  ;;  %v438_v28 = vmul.f32 0.5, %v1731_v17  ;;  %1600 = vmatmul.msk.f32.gmra.mxu2 %vm65_vm0, %v51_v14  ;;  %v34_v17 = vld [vmem:[%s2671_s0 + $0x48] sm:$0xff] }
 0x28c   :  { %1732 = vtanh.f32 %v431_v18  ;;  %1582 = vmatmul.msk.f32.gmra.mxu0 %vm65_vm0, %v33_v15  ;;  %v35_v18 = vld [vmem:[%s2671_s0 + $0x50] sm:$0xff] }
 0x28d   :  { %v442_v30 = vadd.f32 0.5, %v438_v28 }
 0x292   :  { %v1733_v19 = vpop.eup %1732 }
 0x293   :  { %474 = vrot.lane.b32.xlu0 %v1733_v19, %s1891_s18 }
 0x294   :  { %1583 = vmatmul.msk.f32.gmra.mxu0 %vm65_vm0, %v34_v17 }
 0x29b   :  { %450 = vrot.lane.b32.xlu0 %v1982_v29, %s1891_s18  ;;  %v439_v29 = vmul.f32 0.5, %v1733_v19 }
 0x29c   :  { %1584 = vmatmul.msk.f32.gmra.mxu0 %vm65_vm0, %v35_v18 }
 0x29d   :  { %v443_v33 = vadd.f32 0.5, %v439_v29 }
 0x2bd   :  { %v469_v22 = vpop.permute.xlu0 %468 }
 0x2be   :  { %v480_v23 = vmul.f32 %v469_v22, %v440_v21 }
 0x2c0   :  { %488 = vrot.lane.b32.xlu2 %v480_v23, %s1891_s18 }
 0x2c8   :  { %452 = vrot.lane.b32.xlu2 %v1986_v34, %s1891_s18 }
 0x2dd   :  { %v471_v26 = vpop.permute.xlu1 %470 }
 0x2de   :  { %v481_v27 = vmul.f32 %v471_v26, %v441_v25 }
 0x2e0   :  { %490 = vrot.lane.b32.xlu1 %v481_v27, %s1891_s18 }
 0x2e5   :  { %v473_v31 = vpop.permute.xlu2 %472  ;;  %v449_v34 = vpop.permute.xlu1 %448 }
 0x2e6   :  { %v482_v32 = vmul.f32 %v473_v31, %v442_v30  ;;  %v460_v37 = vmul.f32 %v449_v34, %v440_v21  ;;  %v2169_v23 = vpop.f32.mrf.mxu2 }
 0x2e8   :  { %454 = vrot.lane.b32.xlu1 %v1990_v39, %s1891_s18  ;;  %492 = vrot.lane.b32.xlu0 %v482_v32, %s1891_s18 }
 0x2ee   :  { %v2171_v24 = vpop.f32.mrf.mxu2 }
 0x305   :  { %v475_v35 = vpop.permute.xlu0 %474 }
 0x306   :  { %v483_v36 = vmul.f32 %v475_v35, %v443_v33 }
 0x308   :  { %494 = vrot.lane.b32.xlu2 %v483_v36, %s1891_s18 }
 0x309   :  { %v203_v28 = vpop.f32.mrf.mxu0 }
 0x30d   :  { %v451_v42 = vpop.permute.xlu0 %450 }
 0x30e   :  { %v461_v39 = vmul.f32 %v451_v42, %v441_v25 }
 0x31a   :  { %v489_v38 = vpop.permute.xlu2 %488 }
 0x31b   :  { %v2089_v40 = vadd.f32 %v489_v38, %v460_v37 }
 0x31d   :  { %1734 = vtanh.f32 %v2089_v40 }
 0x322   :  { %v453_v45 = vpop.permute.xlu2 %452 }
 0x323   :  { %v1735_v41 = vpop.eup %1734  ;;  %v462_v48 = vmul.f32 %v453_v45, %v442_v30 }
 0x324   :  { %512 = vrot.lane.b32.xlu0 %v1735_v41, %s1891_s18 }
 0x352   :  { %v491_v43 = vpop.permute.xlu1 %490 }
 0x353   :  { %v2093_v44 = vadd.f32 %v491_v43, %v461_v39 }
 0x355   :  { %1736 = vtanh.f32 %v2093_v44 }
 0x35a   :  { %v493_v51 = vpop.permute.xlu0 %492  ;;  %v455_v54 = vpop.permute.xlu1 %454 }
 0x35b   :  { %v1737_v52 = vpop.eup %1736  ;;  %v2096_v53 = vadd.f32 %v493_v51, %v462_v48  ;;  %v463_v55 = vmul.f32 %v455_v54, %v443_v33 }
 0x35c   :  { %514 = vrot.lane.b32.xlu1 %v1737_v52, %s1891_s18 }
 0x35d   :  { %1738 = vtanh.f32 %v2096_v53 }
 0x362   :  { %v495_v57 = vpop.permute.xlu2 %494 }
 0x363   :  { %v1739_v59 = vpop.eup %1738  ;;  %v2100_v63 = vadd.f32 %v495_v57, %v463_v55 }
 0x364   :  { %516 = vrot.lane.b32.xlu2 %v1739_v59, %s1891_s18 }
 0x365   :  { %1740 = vtanh.f32 %v2100_v63 }
 0x36b   :  { %v1741_v0 = vpop.eup %1740 }
 0x36c   :  { %518 = vrot.lane.b32.xlu0 %v1741_v0, %s1891_s18 }
 0x396   :  { %v513_v1 = vpop.permute.xlu0 %512 }
 0x397   :  { %v524_v2 = vmul.f32 %v513_v1, %v440_v21  ;;  %v36_v21 = vld [vmem:[%s2671_s0 + $0x58] sm:$0xff] }
 0x398   :  { %1585 = vmatmul.msk.f32.gmra.mxu0 %vm65_vm0, %v36_v21 }
 0x399   :  { %536 = vrot.lane.b32.xlu1 %v524_v2, %s1892_s19 }
 0x3be   :  { %v517_v3 = vpop.permute.xlu2 %516 }
 0x3bf   :  { %v526_v4 = vmul.f32 %v517_v3, %v442_v30  ;;  %v204_v30 = vadd.f32 %v1969_v8, %v203_v28 }
 0x3c1   :  { %540 = vrot.lane.b32.xlu0 %v526_v4, %s1892_s19 }
 0x3ce   :  { %v515_v7 = vpop.permute.xlu1 %514 }
 0x3cf   :  { %v525_v9 = vmul.f32 %v515_v7, %v441_v25  ;;  %v2173_v25 = vpop.f32.mrf.mxu2 }
 0x3d1   :  { %538 = vrot.lane.b32.xlu2 %v525_v9, %s1892_s19 }
 0x3d7   :  { %v2175_v26 = vpop.f32.mrf.mxu2 }
 0x3de   :  { %v519_v12 = vpop.permute.xlu0 %518 }
 0x3df   :  { %v527_v13 = vmul.f32 %v519_v12, %v443_v33  ;;  %v2177_v27 = vpop.f32.mrf.mxu2  ;;  %v206_v33 = vpop.f32.mrf.mxu0 }
 0x3e0   :  { %v207_v35 = vadd.f32 %v1969_v8, %v206_v33 }
 0x3e1   :  { %542 = vrot.lane.b32.xlu1 %v527_v13, %s1892_s19 }
 0x3e7   :  { %v209_v37 = vpop.f32.mrf.mxu0 }
 0x3e8   :  { %v210_v38 = vadd.f32 %v1969_v8, %v209_v37 }
 0x40b   :  { %v2137_v16 = vpop.permute.xlu1 %536 }
 0x40c   :  { %1610 = vmatmul.msk.f32.vlgmr.msrb.gmra.mxu2 %vm65_vm0, %v2137_v16 }
 0x40d   :  { %1157 = vmatpush.msrb.mxu2 %v2003_v46 }
 0x40f   :  { %1158 = vmatpush.msrb.mxu2 %v2009_v47 }
 0x411   :  { %1159 = vmatpush.msrb.mxu2 %v2020_v49 }
 0x413   :  { %1160 = vmatpush.msrb.mxu2 %v2028_v50 }
 0x415   :  { %v212_v45 = vpop.f32.mrf.mxu0 }
 0x416   :  { %v213_v48 = vadd.f32 %v1969_v8, %v212_v45 }
 0x42b   :  { %v2153_v19 = vpop.permute.xlu2 %538 }
 0x42c   :  { %1611 = vmatmul.msk.f32.gmra.mxu2 %vm65_vm0, %v2153_v19 }
 0x433   :  { %v2157_v20 = vpop.permute.xlu0 %540 }
 0x434   :  { %1612 = vmatmul.msk.f32.gmra.mxu2 %vm65_vm0, %v2157_v20 }
 0x453   :  { %v2165_v22 = vpop.permute.xlu1 %542 }
 0x454   :  { %1613 = vmatmul.msk.f32.gmra.mxu2 %vm65_vm0, %v2165_v22 }
 0x48f   :  { %v569_v31 = vpop.f32.mrf.mxu2 }
 0x490   :  { %v581_v32 = vadd.f32 %v569_v31, %v204_v30 }
 0x492   :  { %1742 = vtanh.f32 %v581_v32 }
 0x498   :  { %v1743_v29 = vpop.eup %1742 }
 0x499   :  { %605 = vrot.lane.b32.xlu2 %v1743_v29, %s1891_s18  ;;  %v589_v55 = vmul.f32 0.5, %v1743_v29 }
 0x49b   :  { %v593_v57 = vadd.f32 0.5, %v589_v55 }
 0x49d   :  { %v597_v14 = vmul.f32 %v593_v57, %v2089_v40 }
 0x4af   :  { %v572_v36 = vpop.f32.mrf.mxu2 }
 0x4b0   :  { %v582_v34 = vadd.f32 %v572_v36, %v207_v35 }
 0x4b2   :  { %1744 = vtanh.f32 %v582_v34 }
 0x4b7   :  { %v575_v41 = vpop.f32.mrf.mxu2 }
 0x4b8   :  { %v1745_v42 = vpop.eup %1744  ;;  %v583_v39 = vadd.f32 %v575_v41, %v210_v38  ;;  %v52_v38 = vld [vmem:[%s2671_s0 + $0xd8] sm:$0xff]  ;;  %v54_v41 = vld [vmem:[%s2671_s0 + $0xe8] sm:$0xff] }
 0x4b9   :  { %607 = vrot.lane.b32.xlu0 %v1745_v42, %s1891_s18  ;;  %v590_v1 = vmul.f32 0.5, %v1745_v42  ;;  %1601 = vmatmul.msk.f32.vlgmr.msra.gmra.mxu3 %vm65_vm0, %v52_v38 }
 0x4ba   :  { %1746 = vtanh.f32 %v583_v39  ;;  %1020 = vmatpush.msra.mxu3 %v2003_v46 }
 0x4bb   :  { %v594_v2 = vadd.f32 0.5, %v590_v1 }
 0x4bc   :  { %1021 = vmatpush.msra.mxu3 %v2009_v47 }
 0x4bd   :  { %v598_v40 = vmul.f32 %v594_v2, %v2093_v44 }
 0x4be   :  { %1022 = vmatpush.msra.mxu3 %v2020_v49 }
 0x4c0   :  { %v1747_v43 = vpop.eup %1746  ;;  %1023 = vmatpush.msra.mxu3 %v2028_v50 }
 0x4c1   :  { %609 = vrot.lane.b32.xlu1 %v1747_v43, %s1891_s18  ;;  %v591_v5 = vmul.f32 0.5, %v1747_v43 }
 0x4c3   :  { %v595_v6 = vadd.f32 0.5, %v591_v5 }
 0x4c5   :  { %v599_v21 = vmul.f32 %v595_v6, %v2096_v53 }
 0x4d7   :  { %v578_v51 = vpop.f32.mrf.mxu2 }
 0x4d8   :  { %v584_v52 = vadd.f32 %v578_v51, %v213_v48  ;;  %v55_v48 = vld [vmem:[%s2671_s0 + $0xf0] sm:$0xff]  ;;  %v56_v51 = vld [vmem:[%s2671_s0 + $0xf8] sm:$0xff] }
 0x4da   :  { %1748 = vtanh.f32 %v584_v52  ;;  %v37_v52 = vld [vmem:[%s2671_s0 + $0x60] sm:$0xff] }
 0x4db   :  { %1586 = vmatmul.msk.f32.gmra.mxu0 %vm65_vm0, %v37_v52 }
 0x4e0   :  { %v1749_v54 = vpop.eup %1748 }
 0x4e1   :  { %611 = vrot.lane.b32.xlu2 %v1749_v54, %s1891_s18  ;;  %v592_v10 = vmul.f32 0.5, %v1749_v54 }
 0x4e3   :  { %v596_v11 = vadd.f32 0.5, %v592_v10 }
 0x4e5   :  { %v600_v53 = vmul.f32 %v596_v11, %v2100_v63  ;;  %v53_v63 = vld [vmem:[%s2671_s0 + $0xe0] sm:$0xff] }
 0x4e6   :  { %1602 = vmatmul.msk.f32.gmra.mxu3 %vm65_vm0, %v53_v63 }
 0x4ee   :  { %1603 = vmatmul.msk.f32.gmra.mxu3 %vm65_vm0, %v54_v41 }
 0x4f3   :  { %v606_v59 = vpop.permute.xlu2 %605 }
 0x4f4   :  { %v617_v0 = vmul.f32 %v606_v59, %v593_v57  ;;  %v38_v59 = vld [vmem:[%s2671_s0 + $0x68] sm:$0xff] }
 0x4f5   :  { %1587 = vmatmul.msk.f32.gmra.mxu0 %vm65_vm0, %v38_v59 }
 0x4f6   :  { %625 = vrot.lane.b32.xlu0 %v617_v0, %s1891_s18  ;;  %1604 = vmatmul.msk.f32.gmra.mxu3 %vm65_vm0, %v55_v48  ;;  %v39_v0 = vld [vmem:[%s2671_s0 + $0x70] sm:$0xff] }
 0x4fd   :  { %1588 = vmatmul.msk.f32.gmra.mxu0 %vm65_vm0, %v39_v0 }
 0x4fe   :  { %1605 = vmatmul.msk.f32.gmra.mxu3 %vm65_vm0, %v56_v51 }
 0x52b   :  { %v608_v3 = vpop.permute.xlu0 %607 }
 0x52c   :  { %v618_v4 = vmul.f32 %v608_v3, %v594_v2 }
 0x52e   :  { %627 = vrot.lane.b32.xlu1 %v618_v4, %s1891_s18 }
 0x533   :  { %v610_v7 = vpop.permute.xlu1 %609 }
 0x534   :  { %v619_v9 = vmul.f32 %v610_v7, %v595_v6 }
 0x536   :  { %629 = vrot.lane.b32.xlu2 %v619_v9, %s1891_s18 }
 0x53b   :  { %v612_v12 = vpop.permute.xlu2 %611 }
 0x53c   :  { %v620_v13 = vmul.f32 %v612_v12, %v596_v11  ;;  %v2275_v1 = vpop.f32.mrf.mxu3 }
 0x53e   :  { %631 = vrot.lane.b32.xlu0 %v620_v13, %s1891_s18 }
 0x568   :  { %v626_v15 = vpop.permute.xlu0 %625 }
 0x569   :  { %v2192_v17 = vadd.f32 %v626_v15, %v597_v14 }
 0x56b   :  { %1750 = vtanh.f32 %v2192_v17 }
 0x571   :  { %v1751_v18 = vpop.eup %1750 }
 0x572   :  { %649 = vrot.lane.b32.xlu1 %v1751_v18, %s1891_s18 }
 0x590   :  { %v630_v28 = vpop.permute.xlu2 %629 }
 0x591   :  { %v2197_v30 = vadd.f32 %v630_v28, %v599_v21 }
 0x593   :  { %1752 = vtanh.f32 %v2197_v30 }
 0x599   :  { %v1753_v31 = vpop.eup %1752 }
 0x59a   :  { %653 = vrot.lane.b32.xlu0 %v1753_v31, %s1891_s18 }
 0x5a0   :  { %v628_v32 = vpop.permute.xlu1 %627 }
 0x5a1   :  { %v2202_v29 = vadd.f32 %v628_v32, %v598_v40 }
 0x5a3   :  { %1754 = vtanh.f32 %v2202_v29 }
 0x5a9   :  { %v1755_v33 = vpop.eup %1754 }
 0x5aa   :  { %651 = vrot.lane.b32.xlu2 %v1755_v33, %s1891_s18 }
 0x5b0   :  { %v632_v35 = vpop.permute.xlu0 %631 }
 0x5b1   :  { %v2207_v36 = vadd.f32 %v632_v35, %v600_v53 }
 0x5b3   :  { %1756 = vtanh.f32 %v2207_v36 }
 0x5b9   :  { %v1757_v34 = vpop.eup %1756 }
 0x5ba   :  { %655 = vrot.lane.b32.xlu1 %v1757_v34, %s1891_s18 }
 0x5e4   :  { %v650_v37 = vpop.permute.xlu1 %649 }
 0x5e5   :  { %v661_v44 = vmul.f32 %v650_v37, %v593_v57 }
 0x5e7   :  { %673 = vrot.lane.b32.xlu2 %v661_v44, %s1892_s19 }
 0x604   :  { %v652_v42 = vpop.permute.xlu2 %651 }
 0x605   :  { %v662_v39 = vmul.f32 %v652_v42, %v594_v2  ;;  %v2277_v2 = vpop.f32.mrf.mxu3 }
 0x607   :  { %675 = vrot.lane.b32.xlu0 %v662_v39, %s1892_s19 }
 0x60c   :  { %v654_v43 = vpop.permute.xlu0 %653 }
 0x60d   :  { %v663_v45 = vmul.f32 %v654_v43, %v595_v6  ;;  %v2279_v3 = vpop.f32.mrf.mxu3  ;;  %v215_v6 = vpop.f32.mrf.mxu0 }
 0x60e   :  { %v216_v7 = vadd.f32 %v1969_v8, %v215_v6 }
 0x60f   :  { %677 = vrot.lane.b32.xlu1 %v663_v45, %s1892_s19 }
 0x615   :  { %v2281_v4 = vpop.f32.mrf.mxu3  ;;  %v218_v12 = vpop.f32.mrf.mxu0 }
 0x616   :  { %v219_v13 = vadd.f32 %v1969_v8, %v218_v12 }
 0x61d   :  { %v2283_v5 = vpop.f32.mrf.mxu3  ;;  %v221_v15 = vpop.f32.mrf.mxu0 }
 0x61e   :  { %v222_v21 = vadd.f32 %v1969_v8, %v221_v15 }
 0x62c   :  { %v656_v54 = vpop.permute.xlu1 %655 }
 0x62d   :  { %v664_v55 = vmul.f32 %v656_v54, %v596_v11 }
 0x62f   :  { %679 = vrot.lane.b32.xlu2 %v664_v55, %s1892_s19 }
 0x641   :  { %v2243_v57 = vpop.permute.xlu2 %673 }
 0x642   :  { %1614 = vmatmul.msk.f32.vlgmr.msrb.gmra.mxu3 %vm65_vm0, %v2243_v57 }
 0x643   :  { %1294 = vmatpush.msrb.mxu3 %v2003_v46  ;;  %v40_v46 = vld [vmem:[%s2671_s0 + $0x78] sm:$0xff] }
 0x644   :  { %1589 = vmatmul.msk.f32.gmra.mxu0 %vm65_vm0, %v40_v46 }
 0x645   :  { %1295 = vmatpush.msrb.mxu3 %v2009_v47 }
 0x647   :  { %1296 = vmatpush.msrb.mxu3 %v2020_v49 }
 0x649   :  { %1297 = vmatpush.msrb.mxu3 %v2028_v50 }
 0x679   :  { %v2263_v47 = vpop.permute.xlu0 %675 }
 0x67a   :  { %1615 = vmatmul.msk.f32.gmra.mxu3 %vm65_vm0, %v2263_v47 }
 0x681   :  { %v2267_v49 = vpop.permute.xlu1 %677 }
 0x682   :  { %1616 = vmatmul.msk.f32.gmra.mxu3 %vm65_vm0, %v2267_v49 }
 0x689   :  { %v2271_v50 = vpop.permute.xlu2 %679 }
 0x68a   :  { %1617 = vmatmul.msk.f32.gmra.mxu3 %vm65_vm0, %v2271_v50 }
 0x6c1   :  { %v224_v32 = vpop.f32.mrf.mxu0 }
 0x6c2   :  { %v225_v33 = vadd.f32 %v1969_v8, %v224_v32 }
 0x6c5   :  { %v706_v9 = vpop.f32.mrf.mxu3 }
 0x6c6   :  { %v718_v10 = vadd.f32 %v706_v9, %v216_v7 }
 0x6c8   :  { %1758 = vtanh.f32 %v718_v10 }
 0x6ce   :  { %v1759_v11 = vpop.eup %1758 }
 0x6cf   :  { %742 = vrot.lane.b32.xlu0 %v1759_v11, %s1891_s18  ;;  %v726_v44 = vmul.f32 0.5, %v1759_v11 }
 0x6d1   :  { %v730_v38 = vadd.f32 0.5, %v726_v44  ;;  %v41_v44 = vld [vmem:[%s2671_s0 + $0x80] sm:$0xff] }
 0x6d2   :  { %1590 = vmatmul.msk.f32.gmra.mxu0 %vm65_vm0, %v41_v44 }
 0x6d3   :  { %v734_v6 = vmul.f32 %v730_v38, %v2192_v17 }
 0x6fd   :  { %v709_v14 = vpop.f32.mrf.mxu3 }
 0x6fe   :  { %v719_v18 = vadd.f32 %v709_v14, %v219_v13 }
 0x700   :  { %1760 = vtanh.f32 %v719_v18 }
 0x705   :  { %v712_v28 = vpop.f32.mrf.mxu3 }
 0x706   :  { %v1761_v31 = vpop.eup %1760  ;;  %v720_v40 = vadd.f32 %v712_v28, %v222_v21 }
 0x707   :  { %744 = vrot.lane.b32.xlu1 %v1761_v31, %s1891_s18  ;;  %v727_v48 = vmul.f32 0.5, %v1761_v31 }
 0x708   :  { %1762 = vtanh.f32 %v720_v40 }
 0x709   :  { %v731_v51 = vadd.f32 0.5, %v727_v48 }
 0x70b   :  { %v735_v11 = vmul.f32 %v731_v51, %v2202_v29 }
 0x70d   :  { %v715_v53 = vpop.f32.mrf.mxu3 }
 0x70e   :  { %v1763_v35 = vpop.eup %1762  ;;  %v721_v34 = vadd.f32 %v715_v53, %v225_v33 }
 0x70f   :  { %746 = vrot.lane.b32.xlu2 %v1763_v35, %s1891_s18  ;;  %v728_v42 = vmul.f32 0.5, %v1763_v35 }
 0x710   :  { %1764 = vtanh.f32 %v721_v34 }
 0x711   :  { %v732_v39 = vadd.f32 0.5, %v728_v42  ;;  %v44_v42 = vld [vmem:[%s2671_s0 + $0x98] sm:$0xff] }
 0x713   :  { %v736_v14 = vmul.f32 %v732_v39, %v2197_v30 }
 0x716   :  { %v1765_v37 = vpop.eup %1764 }
 0x717   :  { %748 = vrot.lane.b32.xlu0 %v1765_v37, %s1891_s18  ;;  %v729_v55 = vmul.f32 0.5, %v1765_v37 }
 0x719   :  { %v733_v59 = vadd.f32 0.5, %v729_v55 }
 0x71b   :  { %v737_v29 = vmul.f32 %v733_v59, %v2207_v36 }
 0x741   :  { %v743_v63 = vpop.permute.xlu0 %742 }
 0x742   :  { %v754_v41 = vmul.f32 %v743_v63, %v730_v38  ;;  %v42_v63 = vld [vmem:[%s2671_s0 + $0x88] sm:$0xff] }
 0x743   :  { %1591 = vmatmul.msk.f32.gmra.mxu0 %vm65_vm0, %v42_v63 }
 0x744   :  { %762 = vrot.lane.b32.xlu1 %v754_v41, %s1891_s18  ;;  %v43_v41 = vld [vmem:[%s2671_s0 + $0x90] sm:$0xff] }
 0x74b   :  { %1592 = vmatmul.msk.f32.gmra.mxu0 %vm65_vm0, %v43_v41 }
 0x753   :  { %1593 = vmatmul.msk.f32.gmra.mxu0 %vm65_vm0, %v44_v42 }
 0x769   :  { %v747_v43 = vpop.permute.xlu2 %746 }
 0x76a   :  { %v756_v45 = vmul.f32 %v747_v43, %v732_v39 }
 0x76c   :  { %766 = vrot.lane.b32.xlu0 %v756_v45, %s1891_s18 }
 0x779   :  { %v745_v52 = vpop.permute.xlu1 %744 }
 0x77a   :  { %v755_v54 = vmul.f32 %v745_v52, %v731_v51 }
 0x77c   :  { %764 = vrot.lane.b32.xlu2 %v755_v54, %s1891_s18 }
 0x789   :  { %v749_v0 = vpop.permute.xlu0 %748 }
 0x78a   :  { %v757_v46 = vmul.f32 %v749_v0, %v733_v59 }
 0x78c   :  { %768 = vrot.lane.b32.xlu1 %v757_v46, %s1891_s18 }
 0x7b6   :  { %v763_v7 = vpop.permute.xlu1 %762 }
 0x7b7   :  { %v2298_v9 = vadd.f32 %v763_v7, %v734_v6 }
 0x7b9   :  { %1766 = vtanh.f32 %v2298_v9 }
 0x7bf   :  { %v1767_v10 = vpop.eup %1766 }
 0x7c0   :  { %786 = vrot.lane.b32.xlu2 %v1767_v10, %s1891_s18 }
 0x7d6   :  { %v765_v12 = vpop.permute.xlu2 %764 }
 0x7d7   :  { %v2303_v13 = vadd.f32 %v765_v12, %v735_v11 }
 0x7d9   :  { %1768 = vtanh.f32 %v2303_v13 }
 0x7de   :  { %v767_v15 = vpop.permute.xlu0 %766 }
 0x7df   :  { %v1769_v18 = vpop.eup %1768  ;;  %v2307_v17 = vadd.f32 %v767_v15, %v736_v14 }
 0x7e0   :  { %788 = vrot.lane.b32.xlu0 %v1769_v18, %s1891_s18 }
 0x7e1   :  { %1770 = vtanh.f32 %v2307_v17 }
 0x7e7   :  { %v1771_v21 = vpop.eup %1770 }
 0x7e8   :  { %790 = vrot.lane.b32.xlu1 %v1771_v21, %s1891_s18 }
 0x7fe   :  { %v769_v28 = vpop.permute.xlu1 %768 }
 0x7ff   :  { %v2313_v31 = vadd.f32 %v769_v28, %v737_v29 }
 0x801   :  { %1772 = vtanh.f32 %v2313_v31 }
 0x807   :  { %v1773_v40 = vpop.eup %1772 }
 0x808   :  { %792 = vrot.lane.b32.xlu2 %v1773_v40, %s1891_s18 }
 0x81a   :  { %v787_v30 = vpop.permute.xlu2 %786 }
 0x81b   :  { %v798_v32 = vmul.f32 %v787_v30, %v730_v38 }
 0x81d   :  { %806 = vrot.lane.b32.xlu0 %v798_v32, %s1892_s19 }
 0x852   :  { %v789_v33 = vpop.permute.xlu0 %788 }
 0x853   :  { %v799_v53 = vmul.f32 %v789_v33, %v731_v51 }
 0x855   :  { %808 = vrot.lane.b32.xlu1 %v799_v53, %s1892_s19 }
 0x85a   :  { %v791_v35 = vpop.permute.xlu1 %790 }
 0x85b   :  { %v800_v34 = vmul.f32 %v791_v35, %v732_v39 }
 0x85d   :  { %810 = vrot.lane.b32.xlu2 %v800_v34, %s1892_s19 }
 0x862   :  { %v793_v36 = vpop.permute.xlu2 %792 }
 0x863   :  { %v801_v37 = vmul.f32 %v793_v36, %v733_v59 }
 0x865   :  { %812 = vrot.lane.b32.xlu0 %v801_v37, %s1892_s19 }
 0x88f   :  { %v807_v38 = vpop.permute.xlu0 %806 }
 0x890   :  { %1638 = vmatmul.msk.f32.vlgmr.msra.gmra.mxu2 %vm65_vm0, %v807_v38 }
 0x8b7   :  { %v811_v43 = vpop.permute.xlu2 %810 }
 0x8c7   :  { %v809_v39 = vpop.permute.xlu1 %808 }
 0x8c8   :  { %1639 = vmatmul.msk.f32.gmra.mxu2 %vm65_vm0, %v809_v39 }
 0x8d0   :  { %1640 = vmatmul.msk.f32.gmra.mxu2 %vm65_vm0, %v811_v43 }
 0x8d7   :  { %v813_v45 = vpop.permute.xlu0 %812 }
 0x8d8   :  { %1618 = vmatpush.xpose.msk.msra.mxu1 %vm65_vm0, %v813_v45  ;;  %1641 = vmatmul.msk.f32.gmra.mxu2 %vm65_vm0, %v813_v45 }
 0x8dc   :  { %1619 = vmatpush.xpose.msk.msra.mxu1 %vm65_vm0, %v811_v43 }
 0x8e0   :  { %1620 = vmatpush.xpose.msk.msra.mxu1 %vm65_vm0, %v809_v39 }
 0x8e4   :  { %1621 = vmatpush.xpose.msk.msra.mxu1 %vm65_vm0, %v807_v38 }
 0x8e8   :  { %1622 = vmatpush.xpose.msk.msra.mxu1 %vm65_vm0, %v2271_v50 }
 0x8ec   :  { %1623 = vmatpush.xpose.msk.msra.mxu1 %vm65_vm0, %v2267_v49 }
 0x8f0   :  { %1624 = vmatpush.xpose.msk.msra.mxu1 %vm65_vm0, %v2263_v47  ;;  %v227_v47 = vpop.f32.mrf.mxu0 }
 0x8f4   :  { %1625 = vmatpush.xpose.msk.msra.mxu1 %vm65_vm0, %v2243_v57 }
 0x8f8   :  { %1626 = vmatpush.xpose.msk.msra.mxu1 %vm65_vm0, %v2165_v22  ;;  %v228_v22 = vadd.f32 %v1969_v8, %v227_v47 }
 0x8fc   :  { %1627 = vmatpush.xpose.msk.msra.mxu1 %vm65_vm0, %v2157_v20 }
 0x900   :  { %1628 = vmatpush.xpose.msk.msra.mxu1 %vm65_vm0, %v2153_v19 }
 0x904   :  { %1629 = vmatpush.xpose.msk.msra.mxu1 %vm65_vm0, %v2137_v16  ;;  %v230_v16 = vpop.f32.mrf.mxu0 }
 0x908   :  { %1630 = vmatpush.xpose.msk.msra.mxu1 %vm65_vm0, %v2063_v61  ;;  %v231_v61 = vadd.f32 %v1969_v8, %v230_v16 }
 0x90c   :  { %1631 = vmatpush.xpose.msk.msra.mxu1 %vm65_vm0, %v2059_v60  ;;  %v233_v60 = vpop.f32.mrf.mxu0 }
 0x910   :  { %1632 = vmatpush.xpose.msk.msra.mxu1 %vm65_vm0, %v2051_v58  ;;  %v234_v58 = vadd.f32 %v1969_v8, %v233_v60 }
 0x913   :  { %v888_v57 = vpop.f32.mrf.mxu2 }
 0x914   :  { %v900_v20 = vadd.f32 %v888_v57, %v228_v22  ;;  %1633 = vmatpush.xpose.msk.msra.mxu1 %vm65_vm0, %v2043_v56  ;;  %v236_v54 = vpop.f32.mrf.mxu0 }
 0x915   :  { %v237_v56 = vadd.f32 %v1969_v8, %v236_v54 }
 0x916   :  { %1774 = vtanh.f32 %v900_v20 }
 0x91c   :  { %v1775_v19 = vpop.eup %1774 }
 0x91d   :  { %924 = vrot.lane.b32.xlu1 %v1775_v19, %s1891_s18  ;;  %v908_v6 = vmul.f32 0.5, %v1775_v19 }
 0x91f   :  { %v912_v7 = vadd.f32 0.5, %v908_v6 }
 0x921   :  { %v916_v53 = vmul.f32 %v912_v7, %v2298_v9 }
 0x94b   :  { %v891_v49 = vpop.f32.mrf.mxu2 }
 0x94c   :  { %v901_v50 = vadd.f32 %v891_v49, %v231_v61  ;;  %v45_v49 = vld [vmem:[%s2671_s0 + $0xa0] sm:$0xff]  ;;  %s1555_s0 = sshll.u32 %s2678_s7, 4  ;;  %s1556_s0 = int_to_ptr.hbm [resolvable:$true] %s1555_s0 }
 0x94d   :  { %1594 = vmatmul.msk.f32.gmra.mxu0 %vm65_vm0, %v45_v49 }
 0x94e   :  { %1776 = vtanh.f32 %v901_v50 }
 0x953   :  { %v894_v48 = vpop.f32.mrf.mxu2 }
 0x954   :  { %v1777_v51 = vpop.eup %1776  ;;  %v902_v52 = vadd.f32 %v894_v48, %v234_v58 }
 0x955   :  { %926 = vrot.lane.b32.xlu2 %v1777_v51, %s1891_s18  ;;  %v909_v12 = vmul.f32 0.5, %v1777_v51 }
 0x956   :  { %1778 = vtanh.f32 %v902_v52  ;;  %v2428_v52 = vld [vmem:[%s2674_s3] ss:$0 sm:$0xff]  ;;  %s1893_s3 = smov 96  }
 0x957   :  { %v913_v14 = vadd.f32 0.5, %v909_v12 }
 0x959   :  { %v917_v37 = vmul.f32 %v913_v14, %v2303_v13 }
 0x95b   :  { %v897_v55 = vpop.f32.mrf.mxu2 }
 0x95c   :  { %v1779_v59 = vpop.eup %1778  ;;  %v903_v0 = vadd.f32 %v897_v55, %v237_v56 }
 0x95d   :  { %928 = vrot.lane.b32.xlu0 %v1779_v59, %s1891_s18  ;;  %v910_v8 = vmul.f32 0.5, %v1779_v59 }
 0x95e   :  { %1780 = vtanh.f32 %v903_v0  ;;  %v243_v0 = vadd.f32 %v2428_v52, %v2067_v62 }
 0x95f   :  { %v914_v21 = vadd.f32 0.5, %v910_v8 }
 0x961   :  { %v918_v13 = vmul.f32 %v914_v21, %v2307_v17 }
 0x964   :  { %v1781_v46 = vpop.eup %1780 }
 0x965   :  { %930 = vrot.lane.b32.xlu1 %v1781_v46, %s1891_s18  ;;  %v911_v40 = vmul.f32 0.5, %v1781_v46 }
 0x967   :  { %v915_v30 = vadd.f32 0.5, %v911_v40 }
 0x969   :  { %v919_v9 = vmul.f32 %v915_v30, %v2313_v31 }
 0x98f   :  { %v925_v10 = vpop.permute.xlu1 %924 }
 0x990   :  { %v936_v11 = vmul.f32 %v925_v10, %v912_v7  ;;  %v246_v10 = vadd.f32 %v2428_v52, %v2169_v23 }
 0x992   :  { %944 = vrot.lane.b32.xlu2 %v936_v11, %s1891_s18 }
 0x9af   :  { %v927_v15 = vpop.permute.xlu2 %926 }
 0x9b0   :  { %v937_v18 = vmul.f32 %v927_v15, %v913_v14 }
 0x9b2   :  { %946 = vrot.lane.b32.xlu0 %v937_v18, %s1891_s18 }
 0x9ca   :  { %v239_v51 = vpop.f32.mrf.mxu0 }
 0x9cb   :  { %v240_v54 = vadd.f32 %v2428_v52, %v239_v51 }
 0x9cf   :  { %v929_v29 = vpop.permute.xlu0 %928 }
 0x9d0   :  { %v938_v28 = vmul.f32 %v929_v29, %v914_v21 }
 0x9d2   :  { %948 = vrot.lane.b32.xlu1 %v938_v28, %s1891_s18 }
 0x9d7   :  { %v931_v32 = vpop.permute.xlu1 %930 }
 0x9d8   :  { %v939_v33 = vmul.f32 %v931_v32, %v915_v30 }
 0x9da   :  { %950 = vrot.lane.b32.xlu2 %v939_v33, %s1891_s18 }
 0x9ec   :  { %v945_v35 = vpop.permute.xlu2 %944 }
 0x9ed   :  { %v2382_v34 = vadd.f32 %v945_v35, %v916_v53 }
 0x9ef   :  { %1782 = vtanh.f32 %v2382_v34 }
 0x9f5   :  { %v1783_v36 = vpop.eup %1782 }
 0x9f6   :  { %968 = vrot.lane.b32.xlu0 %v1783_v36, %s1891_s18 }
 0xa24   :  { %v947_v44 = vpop.permute.xlu0 %946 }
 0xa25   :  { %v2387_v38 = vadd.f32 %v947_v44, %v917_v37 }
 0xa27   :  { %1784 = vtanh.f32 %v2387_v38 }
 0xa2d   :  { %v1785_v63 = vpop.eup %1784 }
 0xa2e   :  { %970 = vrot.lane.b32.xlu1 %v1785_v63, %s1891_s18 }
 0xa34   :  { %v951_v41 = vpop.permute.xlu2 %950 }
 0xa35   :  { %v2392_v42 = vadd.f32 %v951_v41, %v919_v9 }
 0xa37   :  { %1786 = vtanh.f32 %v2392_v42 }
 0xa3d   :  { %v1787_v39 = vpop.eup %1786 }
 0xa3e   :  { %974 = vrot.lane.b32.xlu0 %v1787_v39, %s1891_s18 }
 0xa44   :  { %v949_v43 = vpop.permute.xlu1 %948 }
 0xa45   :  { %v2397_v45 = vadd.f32 %v949_v43, %v918_v13 }
 0xa47   :  { %1788 = vtanh.f32 %v2397_v45 }
 0xa4d   :  { %v1789_v47 = vpop.eup %1788 }
 0xa4e   :  { %972 = vrot.lane.b32.xlu2 %v1789_v47, %s1891_s18 }
 0xa68   :  { %v969_v22 = vpop.permute.xlu0 %968 }
 0xa69   :  { %v980_v31 = vmul.f32 %v969_v22, %v912_v7 }
 0xa6b   :  { %992 = vrot.lane.b32.xlu1 %v980_v31, %s1892_s19 }
 0xaa0   :  { %v971_v57 = vpop.permute.xlu1 %970 }
 0xaa1   :  { %v981_v20 = vmul.f32 %v971_v57, %v913_v14  ;;  %v249_v14 = vadd.f32 %v2428_v52, %v2171_v24 }
 0xaa3   :  { %994 = vrot.lane.b32.xlu2 %v981_v20, %s1892_s19 }
 0xaa8   :  { %v973_v19 = vpop.permute.xlu2 %972 }
 0xaa9   :  { %v982_v16 = vmul.f32 %v973_v19, %v914_v21 }
 0xaab   :  { %996 = vrot.lane.b32.xlu0 %v982_v16, %s1892_s19 }
 0xab0   :  { %v975_v17 = vpop.permute.xlu0 %974 }
 0xab1   :  { %v983_v61 = vmul.f32 %v975_v17, %v915_v30 }
 0xab3   :  { %998 = vrot.lane.b32.xlu1 %v983_v61, %s1892_s19 }
 0xadd   :  { %v2409_v60 = vpop.permute.xlu1 %992 }
 0xade   :  { %1642 = vmatmul.msk.f32.vlgmr.msra.gmra.mxu3 %vm65_vm0, %v2409_v60 }
 0xafd   :  { %v2413_v50 = vpop.permute.xlu2 %994 }
 0xafe   :  { %1643 = vmatmul.msk.f32.gmra.mxu3 %vm65_vm0, %v2413_v50 }
 0xb1d   :  { %v2417_v58 = vpop.permute.xlu0 %996 }
 0xb1e   :  { %1644 = vmatmul.msk.f32.gmra.mxu3 %vm65_vm0, %v2417_v58 }
 0xb25   :  { %v2421_v48 = vpop.permute.xlu1 %998 }
 0xb26   :  { %1645 = vmatmul.msk.f32.gmra.mxu3 %vm65_vm0, %v2421_v48 }
 0xb61   :  { %v1025_v56 = vpop.f32.mrf.mxu3 }
 0xb62   :  { %v1037_v55 = vadd.f32 %v1025_v56, %v240_v54 }
 0xb64   :  { %1790 = vtanh.f32 %v1037_v55 }
 0xb6a   :  { %v1791_v59 = vpop.eup %1790 }
 0xb6b   :  { %1061 = vrot.lane.b32.xlu2 %v1791_v59, %s1891_s18  ;;  %v1045_v21 = vmul.f32 0.5, %v1791_v59 }
 0xb6d   :  { %v1049_v29 = vadd.f32 0.5, %v1045_v21 }
 0xb6f   :  { %v1053_v41 = vmul.f32 %v1049_v29, %v2382_v34 }
 0xb81   :  { %v1028_v46 = vpop.f32.mrf.mxu3 }
 0xb82   :  { %v1038_v6 = vadd.f32 %v1028_v46, %v243_v0 }
 0xb84   :  { %1792 = vtanh.f32 %v1038_v6 }
 0xb8a   :  { %v1793_v7 = vpop.eup %1792 }
 0xb8b   :  { %1063 = vrot.lane.b32.xlu0 %v1793_v7, %s1891_s18  ;;  %v1046_v23 = vmul.f32 0.5, %v1793_v7 }
 0xb8d   :  { %v1050_v30 = vadd.f32 0.5, %v1046_v23 }
 0xb8f   :  { %v1054_v47 = vmul.f32 %v1050_v30, %v2387_v38 }
 0xba1   :  { %v1031_v11 = vpop.f32.mrf.mxu3 }
 0xba2   :  { %v1039_v12 = vadd.f32 %v1031_v11, %v246_v10  ;;  %v252_v11 = vadd.f32 %v2428_v52, %v2173_v25 }
 0xba4   :  { %1794 = vtanh.f32 %v1039_v12 }
 0xba9   :  { %v1034_v15 = vpop.f32.mrf.mxu3 }
 0xbaa   :  { %v1795_v18 = vpop.eup %1794  ;;  %v1040_v8 = vadd.f32 %v1034_v15, %v249_v14 }
 0xbab   :  { %1065 = vrot.lane.b32.xlu1 %v1795_v18, %s1891_s18  ;;  %v1047_v37 = vmul.f32 0.5, %v1795_v18  ;;  %v255_v18 = vadd.f32 %v2428_v52, %v2175_v26 }
 0xbac   :  { %1796 = vtanh.f32 %v1040_v8 }
 0xbad   :  { %v1051_v44 = vadd.f32 0.5, %v1047_v37 }
 0xbaf   :  { %v1055_v57 = vmul.f32 %v1051_v44, %v2397_v45 }
 0xbb2   :  { %v1797_v62 = vpop.eup %1796 }
 0xbb3   :  { %1067 = vrot.lane.b32.xlu2 %v1797_v62, %s1891_s18  ;;  %v1048_v24 = vmul.f32 0.5, %v1797_v62 }
 0xbb5   :  { %v1052_v53 = vadd.f32 0.5, %v1048_v24 }
 0xbb7   :  { %v1056_v16 = vmul.f32 %v1052_v53, %v2392_v42 }
 0xbc5   :  { %v1062_v28 = vpop.permute.xlu2 %1061 }
 0xbc6   :  { %v1073_v40 = vmul.f32 %v1062_v28, %v1049_v29 }
 0xbc8   :  { %1081 = vrot.lane.b32.xlu0 %v1073_v40, %s1891_s18  ;;  %v261_v40 = vadd.f32 %v2428_v52, %v2275_v1 }
 0xbfd   :  { %v1064_v32 = vpop.permute.xlu0 %1063 }
 0xbfe   :  { %v1074_v33 = vmul.f32 %v1064_v32, %v1050_v30 }
 0xc00   :  { %1083 = vrot.lane.b32.xlu1 %v1074_v33, %s1891_s18 }
 0xc0d   :  { %v1068_v35 = vpop.permute.xlu2 %1067 }
 0xc0e   :  { %v1076_v36 = vmul.f32 %v1068_v35, %v1052_v53 }
 0xc10   :  { %1087 = vrot.lane.b32.xlu0 %v1076_v36, %s1891_s18 }
 0xc1d   :  { %v1066_v63 = vpop.permute.xlu1 %1065 }
 0xc1e   :  { %v1075_v9 = vmul.f32 %v1066_v63, %v1051_v44 }
 0xc20   :  { %1085 = vrot.lane.b32.xlu2 %v1075_v9, %s1891_s18 }
 0xc3a   :  { %v1082_v39 = vpop.permute.xlu0 %1081 }
 0xc3b   :  { %v2446_v13 = vadd.f32 %v1082_v39, %v1053_v41 }
 0xc3d   :  { %1798 = vtanh.f32 %v2446_v13 }
 0xc43   :  { %v1799_v43 = vpop.eup %1798 }
 0xc44   :  { %1105 = vrot.lane.b32.xlu1 %v1799_v43, %s1891_s18 }
 0xc72   :  { %v1084_v22 = vpop.permute.xlu1 %1083 }
 0xc73   :  { %v2451_v31 = vadd.f32 %v1084_v22, %v1054_v47 }
 0xc75   :  { %1800 = vtanh.f32 %v2451_v31 }
 0xc7a   :  { %v1086_v20 = vpop.permute.xlu2 %1085 }
 0xc7b   :  { %v1801_v19 = vpop.eup %1800  ;;  %v2455_v34 = vadd.f32 %v1086_v20, %v1055_v57 }
 0xc7c   :  { %1107 = vrot.lane.b32.xlu2 %v1801_v19, %s1891_s18 }
 0xc7d   :  { %1802 = vtanh.f32 %v2455_v34 }
 0xc82   :  { %v1088_v17 = vpop.permute.xlu0 %1087 }
 0xc83   :  { %v1803_v61 = vpop.eup %1802  ;;  %v2460_v38 = vadd.f32 %v1088_v17, %v1056_v16 }
 0xc84   :  { %1109 = vrot.lane.b32.xlu0 %v1803_v61, %s1891_s18 }
 0xc85   :  { %1804 = vtanh.f32 %v2460_v38 }
 0xc8b   :  { %v1805_v49 = vpop.eup %1804 }
 0xc8c   :  { %1111 = vrot.lane.b32.xlu1 %v1805_v49, %s1891_s18 }
 0xcb6   :  { %v1106_v45 = vpop.permute.xlu1 %1105 }
 0xcb7   :  { %v1117_v51 = vmul.f32 %v1106_v45, %v1049_v29  ;;  %v258_v29 = vadd.f32 %v2428_v52, %v2177_v27 }
 0xcb9   :  { %1129 = vrot.lane.b32.xlu2 %v1117_v51, %s1892_s19 }
 0xcd6   :  { %v1108_v54 = vpop.permute.xlu2 %1107 }
 0xcd7   :  { %v1118_v56 = vmul.f32 %v1108_v54, %v1050_v30 }
 0xcd9   :  { %1131 = vrot.lane.b32.xlu0 %v1118_v56, %s1892_s19 }
 0xcf6   :  { %v1110_v42 = vpop.permute.xlu0 %1109 }
 0xcf7   :  { %v1119_v55 = vmul.f32 %v1110_v42, %v1051_v44 }
 0xcf9   :  { %1133 = vrot.lane.b32.xlu1 %v1119_v55, %s1892_s19 }
 0xcfe   :  { %v1112_v59 = vpop.permute.xlu1 %1111 }
 0xcff   :  { %v1120_v0 = vmul.f32 %v1112_v59, %v1052_v53 }
 0xd01   :  { %1135 = vrot.lane.b32.xlu2 %v1120_v0, %s1892_s19 }
 0xd13   :  { %v2469_v46 = vpop.permute.xlu2 %1129 }
 0xd14   :  { %1646 = vmatmul.msk.f32.vlgmr.msrb.gmra.mxu2 %vm65_vm0, %v2469_v46 }
 0xd4b   :  { %v2473_v6 = vpop.permute.xlu0 %1131 }
 0xd4c   :  { %1647 = vmatmul.msk.f32.gmra.mxu2 %vm65_vm0, %v2473_v6 }
 0xd5b   :  { %v2481_v10 = vpop.permute.xlu2 %1135 }
 0xd6b   :  { %v2477_v7 = vpop.permute.xlu1 %1133 }
 0xd6c   :  { %1648 = vmatmul.msk.f32.gmra.mxu2 %vm65_vm0, %v2477_v7 }
 0xd74   :  { %1649 = vmatmul.msk.f32.gmra.mxu2 %vm65_vm0, %v2481_v10 }
 0xd97   :  { %v1162_v12 = vpop.f32.mrf.mxu2 }
 0xd98   :  { %v1174_v14 = vadd.f32 %v1162_v12, %v252_v11 }
 0xd9a   :  { %1806 = vtanh.f32 %v1174_v14 }
 0xda0   :  { %v1807_v15 = vpop.eup %1806 }
 0xda1   :  { %1198 = vrot.lane.b32.xlu0 %v1807_v15, %s1891_s18  ;;  %v1182_v33 = vmul.f32 0.5, %v1807_v15 }
 0xda3   :  { %v1186_v24 = vadd.f32 0.5, %v1182_v33 }
 0xda5   :  { %v1190_v57 = vmul.f32 %v1186_v24, %v2446_v13 }
 0xdcf   :  { %v1165_v8 = vpop.f32.mrf.mxu2 }
 0xdd0   :  { %v1175_v62 = vadd.f32 %v1165_v8, %v255_v18 }
 0xdd2   :  { %1808 = vtanh.f32 %v1175_v62 }
 0xdd8   :  { %v1809_v21 = vpop.eup %1808 }
 0xdd9   :  { %1200 = vrot.lane.b32.xlu1 %v1809_v21, %s1891_s18  ;;  %v1183_v27 = vmul.f32 0.5, %v1809_v21 }
 0xddb   :  { %v1187_v36 = vadd.f32 0.5, %v1183_v27  ;;  %v264_v27 = vadd.f32 %v2428_v52, %v2277_v2 }
 0xddd   :  { %v1191_v17 = vmul.f32 %v1187_v36, %v2451_v31 }
 0xdef   :  { %v1168_v28 = vpop.f32.mrf.mxu2 }
 0xdf0   :  { %v1176_v25 = vadd.f32 %v1168_v28, %v258_v29 }
 0xdf2   :  { %1810 = vtanh.f32 %v1176_v25  ;;  %v267_v25 = vadd.f32 %v2428_v52, %v2279_v3 }
 0xdf7   :  { %v1171_v23 = vpop.f32.mrf.mxu2 }
 0xdf8   :  { %v1811_v30 = vpop.eup %1810  ;;  %v1177_v32 = vadd.f32 %v1171_v23, %v261_v40 }
 0xdf9   :  { %1202 = vrot.lane.b32.xlu2 %v1811_v30, %s1891_s18  ;;  %v1184_v1 = vmul.f32 0.5, %v1811_v30  ;;  %v270_v30 = vadd.f32 %v2428_v52, %v2281_v4 }
 0xdfa   :  { %1812 = vtanh.f32 %v1177_v32 }
 0xdfb   :  { %v1188_v63 = vadd.f32 0.5, %v1184_v1 }
 0xdfd   :  { %v1192_v13 = vmul.f32 %v1188_v63, %v2455_v34 }
 0xe00   :  { %v1813_v26 = vpop.eup %1812 }
 0xe01   :  { %1204 = vrot.lane.b32.xlu0 %v1813_v26, %s1891_s18  ;;  %v1185_v39 = vmul.f32 0.5, %v1813_v26 }
 0xe03   :  { %v1189_v43 = vadd.f32 0.5, %v1185_v39 }
 0xe05   :  { %v1193_v31 = vmul.f32 %v1189_v43, %v2460_v38 }
 0xe13   :  { %v1199_v53 = vpop.permute.xlu0 %1198 }
 0xe14   :  { %v1210_v35 = vmul.f32 %v1199_v53, %v1186_v24  ;;  %v273_v53 = vadd.f32 %v2428_v52, %v2283_v5 }
 0xe16   :  { %1218 = vrot.lane.b32.xlu1 %v1210_v35, %s1891_s18 }
 0xe4b   :  { %v1201_v37 = vpop.permute.xlu1 %1200 }
 0xe4c   :  { %v1211_v44 = vmul.f32 %v1201_v37, %v1187_v36 }
 0xe4e   :  { %1220 = vrot.lane.b32.xlu2 %v1211_v44, %s1891_s18 }
 0xe53   :  { %v1203_v9 = vpop.permute.xlu2 %1202 }
 0xe54   :  { %v1212_v41 = vmul.f32 %v1203_v9, %v1188_v63 }
 0xe56   :  { %1222 = vrot.lane.b32.xlu0 %v1212_v41, %s1891_s18 }
 0xe73   :  { %v1205_v47 = vpop.permute.xlu0 %1204 }
 0xe74   :  { %v1213_v22 = vmul.f32 %v1205_v47, %v1189_v43 }
 0xe76   :  { %1224 = vrot.lane.b32.xlu1 %v1213_v22, %s1891_s18 }
 0xe88   :  { %v1219_v20 = vpop.permute.xlu1 %1218 }
 0xe89   :  { %v2502_v19 = vadd.f32 %v1219_v20, %v1190_v57 }
 0xe8b   :  { %1814 = vtanh.f32 %v2502_v19 }
 0xe91   :  { %v1815_v16 = vpop.eup %1814 }
 0xe92   :  { %1242 = vrot.lane.b32.xlu2 %v1815_v16, %s1891_s18 }
 0xea8   :  { %v1221_v61 = vpop.permute.xlu2 %1220 }
 0xea9   :  { %v2507_v49 = vadd.f32 %v1221_v61, %v1191_v17 }
 0xeab   :  { %1816 = vtanh.f32 %v2507_v49 }
 0xeb1   :  { %v1817_v45 = vpop.eup %1816 }
 0xeb2   :  { %1244 = vrot.lane.b32.xlu0 %v1817_v45, %s1891_s18 }
 0xec8   :  { %v1223_v51 = vpop.permute.xlu0 %1222 }
 0xec9   :  { %v2512_v54 = vadd.f32 %v1223_v51, %v1192_v13 }
 0xecb   :  { %1818 = vtanh.f32 %v2512_v54 }
 0xed1   :  { %v1819_v56 = vpop.eup %1818 }
 0xed2   :  { %1246 = vrot.lane.b32.xlu1 %v1819_v56, %s1891_s18 }
 0xee8   :  { %v1225_v42 = vpop.permute.xlu1 %1224 }
 0xee9   :  { %v2517_v55 = vadd.f32 %v1225_v42, %v1193_v31 }
 0xeeb   :  { %1820 = vtanh.f32 %v2517_v55 }
 0xeec   :  { %v1243_v59 = vpop.permute.xlu2 %1242 }
 0xeed   :  { %v1254_v0 = vmul.f32 %v1243_v59, %v1186_v24 }
 0xeef   :  { %1266 = vrot.lane.b32.xlu0 %v1254_v0, %s1892_s19 }
 0xef1   :  { %v1821_v34 = vpop.eup %1820 }
 0xef2   :  { %1248 = vrot.lane.b32.xlu2 %v1821_v34, %s1891_s18 }
 0xf24   :  { %v1245_v11 = vpop.permute.xlu0 %1244 }
 0xf25   :  { %v1255_v12 = vmul.f32 %v1245_v11, %v1187_v36 }
 0xf27   :  { %1268 = vrot.lane.b32.xlu1 %v1255_v12, %s1892_s19 }
 0xf44   :  { %v1247_v14 = vpop.permute.xlu1 %1246 }
 0xf45   :  { %v1256_v15 = vmul.f32 %v1247_v14, %v1188_v63 }
 0xf47   :  { %1270 = vrot.lane.b32.xlu2 %v1256_v15, %s1892_s19 }
 0xf4c   :  { %v1249_v38 = vpop.permute.xlu2 %1248 }
 0xf4d   :  { %v1257_v18 = vmul.f32 %v1249_v38, %v1189_v43 }
 0xf4f   :  { %1272 = vrot.lane.b32.xlu0 %v1257_v18, %s1892_s19 }
 0xf61   :  { %v2525_v8 = vpop.permute.xlu0 %1266 }
 0xf62   :  { %1650 = vmatmul.msk.f32.vlgmr.msrb.gmra.mxu3 %vm65_vm0, %v2525_v8 }
 0xf99   :  { %v2529_v62 = vpop.permute.xlu1 %1268 }
 0xf9a   :  { %1651 = vmatmul.msk.f32.gmra.mxu3 %vm65_vm0, %v2529_v62 }
 0xfa1   :  { %v2533_v21 = vpop.permute.xlu2 %1270 }
 0xfa2   :  { %1652 = vmatmul.msk.f32.gmra.mxu3 %vm65_vm0, %v2533_v21 }
 0xfc1   :  { %v2537_v29 = vpop.permute.xlu0 %1272 }
 0xfc2   :  { %1653 = vmatmul.msk.f32.gmra.mxu3 %vm65_vm0, %v2537_v29 }
 0xfe5   :  { %v1299_v28 = vpop.f32.mrf.mxu3 }
 0xfe6   :  { %v1311_v36 = vadd.f32 %v1299_v28, %v264_v27  ;;  %v313_v27 = vld [vmem:[%s2675_s4 + $0x10] sm:$0xff] }
0x101d   :  { %v1302_v40 = vpop.f32.mrf.mxu3 }
0x101e   :  { %v1312_v23 = vadd.f32 %v1302_v40, %v267_v25 }
0x1020   :  { %1822 = vtanh.f32 %v1312_v23 }
0x1025   :  { %v1305_v32 = vpop.f32.mrf.mxu3 }
0x1026   :  { %v1823_v26 = vpop.eup %1822  ;;  %v1313_v33 = vadd.f32 %v1305_v32, %v270_v30 }
0x1027   :  { %1337 = vrot.lane.b32.xlu0 %v1823_v26, %s1891_s18  ;;  %v1320_v5 = vmul.f32 0.5, %v1823_v26 }
0x1028   :  { %1824 = vtanh.f32 %v1313_v33 }
0x1029   :  { %v1324_v41 = vadd.f32 0.5, %v1320_v5 }
0x102b   :  { %v1328_v56 = vmul.f32 %v1324_v41, %v2507_v49 }
0x102e   :  { %v1825_v24 = vpop.eup %1824 }
0x102f   :  { %1339 = vrot.lane.b32.xlu2 %v1825_v24, %s1891_s18  ;;  %v1321_v44 = vmul.f32 0.5, %v1825_v24  ;;  %v311_v24 = vld [vmem:[%s2675_s4] sm:$0xff] }
0x1030   :  { %1634 = vmatmul.msk.f32.vlgmr.msra.gmra.mxu1 %vm65_vm0, %v311_v24 }
0x1031   :  { %v1325_v1 = vadd.f32 0.5, %v1321_v44 }
0x1033   :  { %v1329_v61 = vmul.f32 %v1325_v1, %v2512_v54 }
0x1045   :  { %v1308_v35 = vpop.f32.mrf.mxu3 }
0x1046   :  { %v1314_v3 = vadd.f32 %v1308_v35, %v273_v53  ;;  %v312_v35 = vld [vmem:[%s2675_s4 + $0x8] sm:$0xff] }
0x1047   :  { %1635 = vmatmul.msk.f32.gmra.mxu1 %vm65_vm0, %v312_v35 }
0x1048   :  { %1826 = vtanh.f32 %v1314_v3 }
0x1049   :  { %1828 = vtanh.f32 %v1311_v36 }
0x104e   :  { %v1827_v4 = vpop.eup %1826 }
0x104f   :  { %1341 = vrot.lane.b32.xlu1 %v1827_v4, %s1891_s18  ;;  %v1829_v37 = vpop.eup %1828  ;;  %v1322_v2 = vmul.f32 0.5, %v1827_v4  ;;  %1636 = vmatmul.msk.f32.gmra.mxu1 %vm65_vm0, %v313_v27 }
0x1050   :  { %v1319_v57 = vmul.f32 0.5, %v1829_v37 }
0x1051   :  { %v1326_v52 = vadd.f32 0.5, %v1322_v2 }
0x1052   :  { %v1323_v20 = vadd.f32 0.5, %v1319_v57 }
0x1053   :  { %v1330_v0 = vmul.f32 %v1326_v52, %v2517_v55 }
0x1054   :  { %v1327_v54 = vmul.f32 %v1323_v20, %v2502_v19 }
0x1057   :  { %1335 = vrot.lane.b32.xlu1 %v1829_v37, %s1891_s18  ;;  %v314_v37 = vld [vmem:[%s2675_s4 + $0x18] sm:$0xff] }
0x1058   :  { %1637 = vmatmul.msk.f32.gmra.mxu1 %vm65_vm0, %v314_v37 }
0x1089   :  { %v1340_v63 = vpop.permute.xlu2 %1339 }
0x108a   :  { %v1349_v9 = vmul.f32 %v1340_v63, %v1325_v1 }
0x108c   :  { %1359 = vrot.lane.b32.xlu0 %v1349_v9, %s1891_s18 }
0x1099   :  { %v1338_v39 = vpop.permute.xlu0 %1337 }
0x109a   :  { %v1348_v43 = vmul.f32 %v1338_v39, %v1324_v41 }
0x109c   :  { %1357 = vrot.lane.b32.xlu1 %v1348_v43, %s1891_s18 }
0x10c1   :  { %v1342_v47 = vpop.permute.xlu1 %1341 }
0x10c2   :  { %v1350_v22 = vmul.f32 %v1342_v47, %v1326_v52 }
0x10c4   :  { %1361 = vrot.lane.b32.xlu2 %v1350_v22, %s1891_s18 }
0x10c9   :  { %v1336_v16 = vpop.permute.xlu1 %1335 }
0x10ca   :  { %v1347_v17 = vmul.f32 %v1336_v16, %v1323_v20 }
0x10cc   :  { %1355 = vrot.lane.b32.xlu2 %v1347_v17, %s1891_s18 }
0x10fe   :  { %v1360_v45 = vpop.permute.xlu0 %1359 }
0x10ff   :  { %v1369_v13 = vadd.f32 %v1360_v45, %v1329_v61 }
0x1101   :  { %1830 = vtanh.f32 %v1369_v13 }
0x1107   :  { %v1831_v51 = vpop.eup %1830 }
0x1108   :  { %1383 = vrot.lane.b32.xlu1 %v1831_v51, %s1891_s18 }
0x110e   :  { %v1358_v31 = vpop.permute.xlu1 %1357 }
0x110f   :  { %v1368_v42 = vadd.f32 %v1358_v31, %v1328_v56 }
0x1111   :  { %1832 = vtanh.f32 %v1368_v42 }
0x1117   :  { %v1833_v59 = vpop.eup %1832 }
0x1118   :  { %1381 = vrot.lane.b32.xlu2 %v1833_v59, %s1891_s18 }
0x111e   :  { %v1362_v34 = vpop.permute.xlu2 %1361 }
0x111f   :  { %v1370_v11 = vadd.f32 %v1362_v34, %v1330_v0 }
0x1121   :  { %1834 = vtanh.f32 %v1370_v11 }
0x1126   :  { %v1356_v12 = vpop.permute.xlu2 %1355 }
0x1127   :  { %v1835_v14 = vpop.eup %1834  ;;  %v1367_v15 = vadd.f32 %v1356_v12, %v1327_v54 }
0x1128   :  { %1385 = vrot.lane.b32.xlu0 %v1835_v14, %s1891_s18 }
0x1129   :  { %1836 = vtanh.f32 %v1367_v15 }
0x112f   :  { %v1837_v49 = vpop.eup %1836 }
0x1130   :  { %1379 = vrot.lane.b32.xlu0 %v1837_v49, %s1891_s18 }
0x1172   :  { %v1382_v38 = vpop.permute.xlu2 %1381 }
0x1173   :  { %v1392_v18 = vmul.f32 %v1382_v38, %v1324_v41 }
0x1175   :  { %1401 = vrot.lane.b32.xlu0 %v1392_v18, %s1892_s19 }
0x117a   :  { %v1384_v28 = vpop.permute.xlu1 %1383 }
0x117b   :  { %v1393_v55 = vmul.f32 %v1384_v28, %v1325_v1 }
0x117d   :  { %1403 = vrot.lane.b32.xlu2 %v1393_v55, %s1892_s19  ;;  %1489 = vrot.lane.b32.xlu0 %v1369_v13, %s1893_s3 }
0x1185   :  { %1491 = vrot.lane.b32.xlu2 %v1370_v11, %s1893_s3 }
0x118d   :  { %1485 = vrot.lane.b32.xlu2 %v1367_v15, %s1893_s3 }
0x119a   :  { %v1386_v19 = vpop.permute.xlu0 %1385 }
0x119b   :  { %v1394_v25 = vmul.f32 %v1386_v19, %v1326_v52 }
0x119d   :  { %1405 = vrot.lane.b32.xlu1 %v1394_v25, %s1892_s19 }
0x11a2   :  { %v1380_v40 = vpop.permute.xlu0 %1379 }
0x11a3   :  { %v1391_v23 = vmul.f32 %v1380_v40, %v1323_v20 }
0x11a5   :  { %1399 = vrot.lane.b32.xlu1 %v1391_v23, %s1892_s19 }
0x11ad   :  { %1487 = vrot.lane.b32.xlu1 %v1368_v42, %s1893_s3  ;;  %s1897_s3 = smov 8  }
0x11d7   :  { %v1404_v30 = vpop.permute.xlu2 %1403 }
0x11df   :  { %v1492_v32 = vpop.permute.xlu2 %1491 }
0x11e0   :  { %1682 = vmatpush.xpose.msk.msra.mxu3 %vm65_vm0, %v1492_v32 }
0x11e7   :  { %v1402_v26 = vpop.permute.xlu0 %1401  ;;  %v1486_v4 = vpop.permute.xlu2 %1485 }
0x11ef   :  { %v1490_v33 = vpop.permute.xlu0 %1489 }
0x11f0   :  { %1683 = vmatpush.xpose.msk.msra.mxu3 %vm65_vm0, %v1490_v33 }
0x120f   :  { %v1406_v53 = vpop.permute.xlu1 %1405 }
0x1210   :  { %1654 = vmatpush.xpose.msk.msrb.mxu1 %vm65_vm0, %v1406_v53  ;;  %1674 = vmatpush.xpose.msk.msra.mxu2 %vm65_vm0, %v1406_v53 }
0x1214   :  { %1655 = vmatpush.xpose.msk.msrb.mxu1 %vm65_vm0, %v1404_v30  ;;  %1675 = vmatpush.xpose.msk.msra.mxu2 %vm65_vm0, %v1404_v30 }
0x1217   :  { %v1400_v3 = vpop.permute.xlu1 %1399 }
0x1218   :  { %1656 = vmatpush.xpose.msk.msrb.mxu1 %vm65_vm0, %v1402_v26  ;;  %1676 = vmatpush.xpose.msk.msra.mxu2 %vm65_vm0, %v1402_v26 }
0x121c   :  { %1657 = vmatpush.xpose.msk.msrb.mxu1 %vm65_vm0, %v1400_v3  ;;  %1677 = vmatpush.xpose.msk.msra.mxu2 %vm65_vm0, %v1400_v3 }
0x121f   :  { %v1488_v36 = vpop.permute.xlu1 %1487  ;;  %1678 = vmatmul.msk.f32.vlgmr.msra.gmra.mxu2 %vm65_vm0, %v311_v24 }
0x1220   :  { %1658 = vmatpush.xpose.msk.msrb.mxu1 %vm65_vm0, %v2537_v29  ;;  %1684 = vmatpush.xpose.msk.msra.mxu3 %vm65_vm0, %v1488_v36 }
0x1224   :  { %1659 = vmatpush.xpose.msk.msrb.mxu1 %vm65_vm0, %v2533_v21  ;;  %1685 = vmatpush.xpose.msk.msra.mxu3 %vm65_vm0, %v1486_v4 }
0x1227   :  { %1686 = vmatmul.msk.f32.vlgmr.msra.gmra.mxu3 %vm65_vm0, %v311_v24  ;;  %1679 = vmatmul.msk.f32.gmra.mxu2 %vm65_vm0, %v312_v35 }
0x1228   :  { %1660 = vmatpush.xpose.msk.msrb.mxu1 %vm65_vm0, %v2529_v62 }
0x122c   :  { %1661 = vmatpush.xpose.msk.msrb.mxu1 %vm65_vm0, %v2525_v8 }
0x122f   :  { %1687 = vmatmul.msk.f32.gmra.mxu3 %vm65_vm0, %v312_v35  ;;  %1680 = vmatmul.msk.f32.gmra.mxu2 %vm65_vm0, %v313_v27 }
0x1230   :  { %1662 = vmatpush.xpose.msk.msrb.mxu1 %vm65_vm0, %v2481_v10 }
0x1234   :  { %1663 = vmatpush.xpose.msk.msrb.mxu1 %vm65_vm0, %v2477_v7 }
0x1237   :  { %1688 = vmatmul.msk.f32.gmra.mxu3 %vm65_vm0, %v313_v27  ;;  %1681 = vmatmul.msk.f32.gmra.mxu2 %vm65_vm0, %v314_v37 }
0x1238   :  { %1664 = vmatpush.xpose.msk.msrb.mxu1 %vm65_vm0, %v2473_v6 }
0x123c   :  { %1665 = vmatpush.xpose.msk.msrb.mxu1 %vm65_vm0, %v2469_v46  ;;  %v851_v46 = vpop.f32.mrf.mxu1 }
0x123d   :  { %863 = vst [vmem:[%s2676_s5] sm:$0xff] %v851_v46 }
0x123f   :  { %1689 = vmatmul.msk.f32.gmra.mxu3 %vm65_vm0, %v314_v37 }
0x1240   :  { %1666 = vmatpush.xpose.msk.msrb.mxu1 %vm65_vm0, %v2421_v48 }
0x1244   :  { %1667 = vmatpush.xpose.msk.msrb.mxu1 %vm65_vm0, %v2417_v58  ;;  %v854_v58 = vpop.f32.mrf.mxu1 }
0x1245   :  { %864 = vst [vmem:[%s2676_s5 + $0x10] sm:$0xff] %v854_v58 }
0x1248   :  { %1668 = vmatpush.xpose.msk.msrb.mxu1 %vm65_vm0, %v2413_v50 }
0x124c   :  { %1669 = vmatpush.xpose.msk.msrb.mxu1 %vm65_vm0, %v2409_v60  ;;  %v857_v50 = vpop.f32.mrf.mxu1 }
0x124d   :  { %865 = vst [vmem:[%s2676_s5 + $0x20] sm:$0xff] %v857_v50 }
0x124f   :  { %1670 = vmatmul.msk.f32.vlgmr.msrb.gmra.mxu1 %vm65_vm0, %v311_v24 }
0x1254   :  { %v860_v60 = vpop.f32.mrf.mxu1 }
0x1255   :  { %866 = vst [vmem:[%s2676_s5 + $0x30] sm:$0xff] %v860_v60 }
0x1257   :  { %1671 = vmatmul.msk.f32.gmra.mxu1 %vm65_vm0, %v312_v35 }
0x125f   :  { %1672 = vmatmul.msk.f32.gmra.mxu1 %vm65_vm0, %v313_v27 }
0x1267   :  { %1673 = vmatmul.msk.f32.gmra.mxu1 %vm65_vm0, %v314_v37 }
0x12a2   :  { %v1465_v48 = vpop.f32.mrf.mxu2 }
0x12a3   :  { %1477 = vst.msk [vmem:[#allocation3] sm:$0xff] %vm65_vm0, %v1465_v48 }
0x12aa   :  { %v1518_v6 = vpop.f32.mrf.mxu3  ;;  %v1468_v7 = vpop.f32.mrf.mxu2 }
0x12ab   :  { %1530 = vst.msk [vmem:[#allocation5] sm:$0xff] %vm65_vm0, %v1518_v6 }
0x12ac   :  { %1478 = vst.msk [vmem:[#allocation3 + $0x8] sm:$0xff] %vm65_vm0, %v1468_v7 }
0x12b2   :  { %v1521_v10 = vpop.f32.mrf.mxu3  ;;  %v1471_v8 = vpop.f32.mrf.mxu2 }
0x12b3   :  { %1531 = vst.msk [vmem:[#allocation5 + $0x8] sm:$0xff] %vm65_vm0, %v1521_v10 }
0x12b4   :  { %1479 = vst.msk [vmem:[#allocation3 + $0x10] sm:$0xff] %vm65_vm0, %v1471_v8 }
0x12ba   :  { %v1524_v62 = vpop.f32.mrf.mxu3  ;;  %v1474_v21 = vpop.f32.mrf.mxu2 }
0x12bb   :  { %1532 = vst.msk [vmem:[#allocation5 + $0x10] sm:$0xff] %vm65_vm0, %v1524_v62 }
0x12bc   :  { %1480 = vst.msk [vmem:[#allocation3 + $0x18] sm:$0xff] %vm65_vm0, %v1474_v21 }
0x12bd   :  { %1548 = dma.vmem_to_hbm [thread:$0]  %s1541_s30, 512, %s1543_s9, [#allocation4], %s1896_s13, %s1896_s13, %s1897_s3  }
0x12c2   :  { %v1527_v29 = vpop.f32.mrf.mxu3 }
0x12c3   :  { %1533 = vst.msk [vmem:[#allocation5 + $0x18] sm:$0xff] %vm65_vm0, %v1527_v29 }
0x12c4   :  { %1561 = dma.vmem_to_hbm [thread:$0]  %s1554_s11, 512, %s1556_s0, [#allocation6], %s1896_s13, %s1896_s13, %s1897_s3  }
0x12cc   :  { %v1432_v44 = vpop.f32.mrf.mxu1 }
0x12cd   :  { %1444 = vst [vmem:[%s2676_s5 + $0x8] sm:$0xff] %v1432_v44 }
0x12d4   :  { %v1435_v1 = vpop.f32.mrf.mxu1 }
0x12d5   :  { %1445 = vst [vmem:[%s2676_s5 + $0x18] sm:$0xff] %v1435_v1 }
0x12dc   :  { %v1438_v63 = vpop.f32.mrf.mxu1 }
0x12dd   :  { %1446 = vst [vmem:[%s2676_s5 + $0x28] sm:$0xff] %v1438_v63 }
0x12e4   :  { %v1441_v9 = vpop.f32.mrf.mxu1 }
0x12e5   :  { %1447 = vst [vmem:[%s2676_s5 + $0x38] sm:$0xff] %v1441_v9 }
0x12e6   :  { %1887 = dma.done.wait [#allocation4], 512  }
0x12e7   :  { %1888 = vsyncadd [#allocation4], 4294966784 }
0x12e8   :  { %1889 = dma.done.wait [#allocation6], 512  }
0x12e9   :  { %1890 = vsyncadd [#allocation6], 4294966784 }
0x12ea   :  { %1572 = vsyncpa [#allocation4], 1 }
0x12eb   :  { %1573 = vsyncpa [#allocation6], 1 }

</bundles_post_ra>
